<compile_context>
chip_gen: v7x
topology: tpu7x:2x2x1
jax: 0.10.0
libtpu: 0.0.40
codegen_flags: <defaults>
</compile_context>

<pallas_src>
import functools

import jax
import jax.numpy as jnp
from jax.experimental import pallas as pl
from jax.experimental.pallas import tpu as pltpu


def _round_up(x, m):
    return ((x + m - 1) // m) * m


def _device_kind():
    try:
        return jax.devices()[0].device_kind.lower()
    except Exception:
        return ""


def _is_v7x(kind):
    return ("v7" in kind) or ("7x" in kind)


def actor_kernel(obs_ref,        # [bB, R]        f32 (cast to bf16 in-kernel)
                 w0_ref,         # [R,  Fp]       bf16
                 w1_ref,         # [Fp, Hp]       bf16
                 w2_ref,         # [Hp, Hp]       bf16
                 w3_ref,         # [Hp, Ap]       bf16
                 bias_ref,       # [6,  P]        f32 (b0, gamma, beta, b1, b2, b3)
                 mu_ref,         # [bB, Ap]       f32
                 *, inv_f, f_pad, h_pad, a_pad):
    # Cast obs on the VPU (hidden under MXU/DMA slack) instead of a wrapper copy.
    obs = obs_ref[...].astype(jnp.bfloat16)

    bias = bias_ref[...]
    b0 = bias[0:1, :f_pad]
    gamma = bias[1:2, :f_pad]
    beta = bias[2:3, :f_pad]
    b1 = bias[3:4, :h_pad]
    b2 = bias[4:5, :h_pad]
    b3 = bias[5:6, :a_pad]

    # ---- trunk: Linear -> LayerNorm (fused one-pass stats) -> Tanh ----------
    h = jnp.dot(obs, w0_ref[...], preferred_element_type=jnp.float32) + b0
    # Padded lanes of h are exactly 0 (zero weight cols, zero bias), so the sums
    # over the padded width equal the sums over the real feature_dim; divide by
    # the REAL feature_dim (inv_f) for correct LN statistics.
    s1 = jnp.sum(h, axis=-1, keepdims=True)
    s2 = jnp.sum(h * h, axis=-1, keepdims=True)
    mean = s1 * inv_f
    var = s2 * inv_f - mean * mean              # one-pass E[x^2]-mean^2 (cheap; fine at these magnitudes)
    h = (h - mean) * jax.lax.rsqrt(var + 1e-5)  # rsqrt -> EUP
    # gamma/beta are 0 in padded lanes -> padded lanes return to exactly 0.
    h = jnp.tanh(h * gamma + beta)              # f32 tanh (v5e-safe)

    # ---- policy MLP: Linear -> ReLU -> Linear -> ReLU -> Linear -> tanh -----
    x = jnp.dot(h.astype(jnp.bfloat16), w1_ref[...],
                preferred_element_type=jnp.float32) + b1
    x = jnp.maximum(x, 0.0)
    x = jnp.dot(x.astype(jnp.bfloat16), w2_ref[...],
                preferred_element_type=jnp.float32) + b2
    x = jnp.maximum(x, 0.0)
    mu = jnp.dot(x.astype(jnp.bfloat16), w3_ref[...],
                 preferred_element_type=jnp.float32) + b3

    mu_ref[...] = jnp.tanh(mu).astype(mu_ref.dtype)
    # TODO(synk): utils.TruncatedNormal(mu, std) has no Pallas equivalent; the
    # kernel returns the mu parameter (std is a constant built in the wrapper).


def prepare_params(params, *, lane=128):
    """One-time parameter prep (call once, reuse across actor steps):
    lane-dense zero padding, bf16 weight casts, and packing of all small f32
    parameter rows into a single [6, P] array."""
    repr_dim, feature_dim = params["w0"].shape
    hidden_dim = params["w1"].shape[1]
    action_dim = params["w3"].shape[1]

    f_pad = _round_up(feature_dim, lane)
    h_pad = _round_up(hidden_dim, lane)
    a_pad = _round_up(action_dim, lane)
    p_max = max(f_pad, h_pad, a_pad)

    def pad2(w, r, c):
        return jnp.zeros((r, c), jnp.float32).at[:w.shape[0], :w.shape[1]].set(w)

    w0 = pad2(params["w0"], repr_dim, f_pad).astype(jnp.bfloat16)
    w1 = pad2(params["w1"], f_pad, h_pad).astype(jnp.bfloat16)
    w2 = pad2(params["w2"], h_pad, h_pad).astype(jnp.bfloat16)
    w3 = pad2(params["w3"], h_pad, a_pad).astype(jnp.bfloat16)

    # Rows: 0=b0, 1=gamma, 2=beta, 3=b1, 4=b2, 5=b3 (zero in all padded lanes).
    bias = jnp.zeros((6, p_max), jnp.float32)
    bias = bias.at[0, :feature_dim].set(params["b0"][0])
    bias = bias.at[1, :feature_dim].set(params["ln_g"][0])
    bias = bias.at[2, :feature_dim].set(params["ln_b"][0])
    bias = bias.at[3, :hidden_dim].set(params["b1"][0])
    bias = bias.at[4, :hidden_dim].set(params["b2"][0])
    bias = bias.at[5, :action_dim].set(params["b3"][0])

    return {
        "w0": w0, "w1": w1, "w2": w2, "w3": w3, "bias": bias,
        "dims": (repr_dim, feature_dim, hidden_dim, action_dim,
                 f_pad, h_pad, a_pad, p_max),
    }


def _choose_block_b(B, kind):
    if _is_v7x(kind) and B >= 16:
        bb = (B + 1) // 2        # >=2 grid steps: "parallel" axis feeds both v7x TCs
    else:
        bb = B                   # v5e/v6e: single TC -> one big step, no per-step overhead
    bb = min(bb, 1024)
    return _round_up(max(bb, 8), 8)


def actor_forward(obs, prepared, std, *, block_b=None):
    """Pallas implementation of Actor.forward.  Returns (mu, std_arr)."""
    B, repr_dim = obs.shape
    (R, F, H, A, f_pad, h_pad, a_pad, p_max) = prepared["dims"]
    assert repr_dim == R

    kind = _device_kind()
    if block_b is None:
        block_b = _choose_block_b(B, kind)
    block_b = _round_up(max(min(block_b, _round_up(B, 8)), 8), 8)

    # Ragged batch: zero-pad rows only when needed (no-op for divisible B).
    B_pad = _round_up(B, block_b)
    obs_in = obs if B_pad == B else jnp.pad(obs, ((0, B_pad - B), (0, 0)))

    grid = (B_pad // block_b,)

    def const_spec(shape):
        # Constant block index -> fetched once; single buffer (no dead double-buffer).
        return pl.BlockSpec(shape, lambda i: (0, 0), pipeline_mode=pl.Buffered(1))

    # Don't request all of v7x's 64 MiB VMEM; leave compiler-scratch headroom.
    vmem_bytes = (48 << 20) if _is_v7x(kind) else (64 << 20)

    kernel = pl.pallas_call(
        functools.partial(actor_kernel, inv_f=1.0 / F,
                          f_pad=f_pad, h_pad=h_pad, a_pad=a_pad),
        out_shape=jax.ShapeDtypeStruct((B_pad, a_pad), jnp.float32),
        grid=grid,
        in_specs=[
            pl.BlockSpec((block_b, R), lambda i: (i, 0)),  # obs tile (f32, cast in-kernel)
            const_spec((R, f_pad)),                        # w0
            const_spec((f_pad, h_pad)),                    # w1
            const_spec((h_pad, h_pad)),                    # w2
            const_spec((h_pad, a_pad)),                    # w3
            const_spec((6, p_max)),                        # packed b0/gamma/beta/b1/b2/b3
        ],
        out_specs=pl.BlockSpec((block_b, a_pad), lambda i: (i, 0)),
        compiler_params=pltpu.CompilerParams(
            dimension_semantics=("parallel",),
            vmem_limit_bytes=vmem_bytes),
    )

    mu_pad = kernel(obs_in, prepared["w0"], prepared["w1"], prepared["w2"],
                    prepared["w3"], prepared["bias"])
    mu = mu_pad[:B, :A]
    # std is a constant array; build it with XLA instead of a lane-sparse kernel
    # output stream.
    std_arr = jnp.full((B, A), std, dtype=mu.dtype)
    return mu, std_arr


def init_params(key, repr_dim, feature_dim, hidden_dim, action_dim):
    ks = jax.random.split(key, 8)
    scale = 0.1
    return {
        # stored as [in, out] (transposed vs PyTorch nn.Linear weight [out, in])
        "w0": scale * jax.random.normal(ks[0], (repr_dim, feature_dim), jnp.float32),
        "b0": scale * jax.random.normal(ks[1], (1, feature_dim), jnp.float32),
        "ln_g": jnp.ones((1, feature_dim), jnp.float32),
        "ln_b": jnp.zeros((1, feature_dim), jnp.float32),
        "w1": scale * jax.random.normal(ks[2], (feature_dim, hidden_dim), jnp.float32),
        "b1": scale * jax.random.normal(ks[3], (1, hidden_dim), jnp.float32),
        "w2": scale * jax.random.normal(ks[4], (hidden_dim, hidden_dim), jnp.float32),
        "b2": scale * jax.random.normal(ks[5], (1, hidden_dim), jnp.float32),
        "w3": scale * jax.random.normal(ks[6], (hidden_dim, action_dim), jnp.float32),
        "b3": scale * jax.random.normal(ks[7], (1, action_dim), jnp.float32),
    }


def actor_reference(obs, params, std):
    """Pure-JAX reference mirroring the kernel's bf16-weight / f32-accum math."""
    w0 = params["w0"].astype(jnp.bfloat16)
    w1 = params["w1"].astype(jnp.bfloat16)
    w2 = params["w2"].astype(jnp.bfloat16)
    w3 = params["w3"].astype(jnp.bfloat16)

    h = jnp.dot(obs.astype(jnp.bfloat16), w0,
                preferred_element_type=jnp.float32) + params["b0"]
    mean = jnp.mean(h, axis=-1, keepdims=True)
    var = jnp.mean((h - mean) ** 2, axis=-1, keepdims=True)
    h = (h - mean) * jax.lax.rsqrt(var + 1e-5)
    h = jnp.tanh(h * params["ln_g"] + params["ln_b"])
    x = jnp.maximum(jnp.dot(h.astype(jnp.bfloat16), w1,
                            preferred_element_type=jnp.float32) + params["b1"], 0.0)
    x = jnp.maximum(jnp.dot(x.astype(jnp.bfloat16), w2,
                            preferred_element_type=jnp.float32) + params["b2"], 0.0)
    mu = jnp.tanh(jnp.dot(x.astype(jnp.bfloat16), w3,
                          preferred_element_type=jnp.float32) + params["b3"])
    return mu, jnp.ones_like(mu) * std


if __name__ == "__main__":
    key = jax.random.PRNGKey(0)
    k_obs, k_par = jax.random.split(key)

    B = 256
    repr_dim, feature_dim, hidden_dim, action_dim = 64, 64, 64, 6
    std = 0.2

    obs = jax.random.normal(k_obs, (B, repr_dim), jnp.float32)
    params = init_params(k_par, repr_dim, feature_dim, hidden_dim, action_dim)

    # One-time parameter prep, hoisted out of the per-step actor call.
    prepared = jax.tree_util.tree_map(jax.block_until_ready, prepare_params(params))

    mu, std_out = actor_forward(obs, prepared, std)
    mu = jax.block_until_ready(mu)
    std_out = jax.block_until_ready(std_out)

    mu_ref, std_ref = actor_reference(obs, params, std)
    assert mu.shape == (B, action_dim) and std_out.shape == (B, action_dim)
    assert jnp.allclose(mu, mu_ref, atol=1e-4, rtol=1e-4)
    assert jnp.allclose(std_out, std_ref, atol=1e-6)

    print("KERNEL_OK")
</pallas_src>

<mosaic_0001>
module attributes {stable_mosaic.version = 11 : i64} {
  func.func @actor_kernel(%arg0: i32, %arg1: memref<256x64xf32, #tpu.memory_space<vmem>>, %arg2: memref<64x128xbf16, #tpu.memory_space<vmem>>, %arg3: memref<128x128xbf16, #tpu.memory_space<vmem>>, %arg4: memref<128x128xbf16, #tpu.memory_space<vmem>>, %arg5: memref<128x128xbf16, #tpu.memory_space<vmem>>, %arg6: memref<6x128xf32, #tpu.memory_space<vmem>>, %arg7: memref<256x128xf32, #tpu.memory_space<vmem>>) attributes {dimension_semantics = [#tpu.dimension_semantics<parallel>], iteration_bounds = array<i64: 1>, scalar_prefetch = 0 : i64, scratch_operands = 0 : i64, tpu.core_type = #tpu.core_type<tc>, window_params = [{transform_indices = @transform_0, window_bounds = array<i64: 256, 64>}, {pipeline_mode = #tpu.pipeline_mode<synchronous>, transform_indices = @transform_1, window_bounds = array<i64: 64, 128>}, {pipeline_mode = #tpu.pipeline_mode<synchronous>, transform_indices = @transform_2, window_bounds = array<i64: 128, 128>}, {pipeline_mode = #tpu.pipeline_mode<synchronous>, transform_indices = @transform_3, window_bounds = array<i64: 128, 128>}, {pipeline_mode = #tpu.pipeline_mode<synchronous>, transform_indices = @transform_4, window_bounds = array<i64: 128, 128>}, {pipeline_mode = #tpu.pipeline_mode<synchronous>, transform_indices = @transform_5, window_bounds = array<i64: 6, 128>}, {transform_indices = @transform_6, window_bounds = array<i64: 256, 128>}]} {
    %c0 = arith.constant 0 : index
    %c0_0 = arith.constant 0 : index
    %0 = vector.load %arg1[%c0, %c0_0] : memref<256x64xf32, #tpu.memory_space<vmem>>, vector<256x64xf32>
    %1 = arith.truncf %0 : vector<256x64xf32> to vector<256x64xbf16>
    %c0_1 = arith.constant 0 : index
    %c0_2 = arith.constant 0 : index
    %2 = vector.load %arg6[%c0_1, %c0_2] : memref<6x128xf32, #tpu.memory_space<vmem>>, vector<6x128xf32>
    %3 = vector.extract_strided_slice %2 {offsets = [0, 0], sizes = [1, 128], strides = [1, 1]} : vector<6x128xf32> to vector<1x128xf32>
    %4 = vector.extract_strided_slice %2 {offsets = [1, 0], sizes = [1, 128], strides = [1, 1]} : vector<6x128xf32> to vector<1x128xf32>
    %5 = vector.extract_strided_slice %2 {offsets = [2, 0], sizes = [1, 128], strides = [1, 1]} : vector<6x128xf32> to vector<1x128xf32>
    %6 = vector.extract_strided_slice %2 {offsets = [3, 0], sizes = [1, 128], strides = [1, 1]} : vector<6x128xf32> to vector<1x128xf32>
    %7 = vector.extract_strided_slice %2 {offsets = [4, 0], sizes = [1, 128], strides = [1, 1]} : vector<6x128xf32> to vector<1x128xf32>
    %8 = vector.extract_strided_slice %2 {offsets = [5, 0], sizes = [1, 128], strides = [1, 1]} : vector<6x128xf32> to vector<1x128xf32>
    %c0_3 = arith.constant 0 : index
    %c0_4 = arith.constant 0 : index
    %9 = vector.load %arg2[%c0_3, %c0_4] : memref<64x128xbf16, #tpu.memory_space<vmem>>, vector<64x128xbf16>
    %cst = arith.constant dense<0.000000e+00> : vector<256x128xf32>
    %10 = tpu.matmul %1, %9, %cst {dimension_numbers = #tpu.dot_dimension_numbers<[1], [0], [0], [1], [0, 0, 1, 1], [], []>} : vector<256x64xbf16>, vector<64x128xbf16>, vector<256x128xf32> -> vector<256x128xf32>
    %11 = vector.broadcast %3 : vector<1x128xf32> to vector<256x128xf32>
    %12 = arith.addf %10, %11 : vector<256x128xf32>
    %cst_5 = arith.constant dense<0.000000e+00> : vector<256xf32>
    %13 = vector.multi_reduction <add>, %12, %cst_5 [1] : vector<256x128xf32> to vector<256xf32>
    %14 = vector.shape_cast %13 : vector<256xf32> to vector<256x1xf32>
    %15 = arith.mulf %12, %12 : vector<256x128xf32>
    %cst_6 = arith.constant dense<0.000000e+00> : vector<256xf32>
    %16 = vector.multi_reduction <add>, %15, %cst_6 [1] : vector<256x128xf32> to vector<256xf32>
    %17 = vector.shape_cast %16 : vector<256xf32> to vector<256x1xf32>
    %cst_7 = arith.constant 1.562500e-02 : f32
    %18 = vector.broadcast %cst_7 : f32 to vector<256x1xf32>
    %19 = arith.mulf %14, %18 : vector<256x1xf32>
    %cst_8 = arith.constant 1.562500e-02 : f32
    %20 = vector.broadcast %cst_8 : f32 to vector<256x1xf32>
    %21 = arith.mulf %17, %20 : vector<256x1xf32>
    %22 = arith.mulf %19, %19 : vector<256x1xf32>
    %23 = arith.subf %21, %22 : vector<256x1xf32>
    %24 = vector.broadcast %19 : vector<256x1xf32> to vector<256x128xf32>
    %25 = arith.subf %12, %24 : vector<256x128xf32>
    %cst_9 = arith.constant 9.99999974E-6 : f32
    %26 = vector.broadcast %cst_9 : f32 to vector<256x1xf32>
    %27 = arith.addf %23, %26 : vector<256x1xf32>
    %28 = math.rsqrt %27 : vector<256x1xf32>
    %29 = vector.broadcast %28 : vector<256x1xf32> to vector<256x128xf32>
    %30 = arith.mulf %25, %29 : vector<256x128xf32>
    %31 = vector.broadcast %4 : vector<1x128xf32> to vector<256x128xf32>
    %32 = arith.mulf %30, %31 : vector<256x128xf32>
    %33 = vector.broadcast %5 : vector<1x128xf32> to vector<256x128xf32>
    %34 = arith.addf %32, %33 : vector<256x128xf32>
    %35 = math.tanh %34 : vector<256x128xf32>
    %36 = arith.truncf %35 : vector<256x128xf32> to vector<256x128xbf16>
    %c0_10 = arith.constant 0 : index
    %c0_11 = arith.constant 0 : index
    %37 = vector.load %arg3[%c0_10, %c0_11] : memref<128x128xbf16, #tpu.memory_space<vmem>>, vector<128x128xbf16>
    %cst_12 = arith.constant dense<0.000000e+00> : vector<256x128xf32>
    %38 = tpu.matmul %36, %37, %cst_12 {dimension_numbers = #tpu.dot_dimension_numbers<[1], [0], [0], [1], [0, 0, 1, 1], [], []>} : vector<256x128xbf16>, vector<128x128xbf16>, vector<256x128xf32> -> vector<256x128xf32>
    %39 = vector.broadcast %6 : vector<1x128xf32> to vector<256x128xf32>
    %40 = arith.addf %38, %39 : vector<256x128xf32>
    %cst_13 = arith.constant 0.000000e+00 : f32
    %41 = vector.broadcast %cst_13 : f32 to vector<256x128xf32>
    %42 = arith.maximumf %40, %41 : vector<256x128xf32>
    %43 = arith.truncf %42 : vector<256x128xf32> to vector<256x128xbf16>
    %c0_14 = arith.constant 0 : index
    %c0_15 = arith.constant 0 : index
    %44 = vector.load %arg4[%c0_14, %c0_15] : memref<128x128xbf16, #tpu.memory_space<vmem>>, vector<128x128xbf16>
    %cst_16 = arith.constant dense<0.000000e+00> : vector<256x128xf32>
    %45 = tpu.matmul %43, %44, %cst_16 {dimension_numbers = #tpu.dot_dimension_numbers<[1], [0], [0], [1], [0, 0, 1, 1], [], []>} : vector<256x128xbf16>, vector<128x128xbf16>, vector<256x128xf32> -> vector<256x128xf32>
    %46 = vector.broadcast %7 : vector<1x128xf32> to vector<256x128xf32>
    %47 = arith.addf %45, %46 : vector<256x128xf32>
    %cst_17 = arith.constant 0.000000e+00 : f32
    %48 = vector.broadcast %cst_17 : f32 to vector<256x128xf32>
    %49 = arith.maximumf %47, %48 : vector<256x128xf32>
    %50 = arith.truncf %49 : vector<256x128xf32> to vector<256x128xbf16>
    %c0_18 = arith.constant 0 : index
    %c0_19 = arith.constant 0 : index
    %51 = vector.load %arg5[%c0_18, %c0_19] : memref<128x128xbf16, #tpu.memory_space<vmem>>, vector<128x128xbf16>
    %cst_20 = arith.constant dense<0.000000e+00> : vector<256x128xf32>
    %52 = tpu.matmul %50, %51, %cst_20 {dimension_numbers = #tpu.dot_dimension_numbers<[1], [0], [0], [1], [0, 0, 1, 1], [], []>} : vector<256x128xbf16>, vector<128x128xbf16>, vector<256x128xf32> -> vector<256x128xf32>
    %53 = vector.broadcast %8 : vector<1x128xf32> to vector<256x128xf32>
    %54 = arith.addf %52, %53 : vector<256x128xf32>
    %55 = math.tanh %54 : vector<256x128xf32>
    %c0_21 = arith.constant 0 : index
    %c0_22 = arith.constant 0 : index
    %56 = vector.load %arg7[%c0_21, %c0_22] : memref<256x128xf32, #tpu.memory_space<vmem>>, vector<256x128xf32>
    tpu.vector_store %arg7[%c0_21, %c0_22], %55 {strides = array<i32>} : memref<256x128xf32, #tpu.memory_space<vmem>>, vector<256x128xf32>,
    return
  }
  func.func @transform_0(%arg0: i32) -> (i32, i32) {
    %c0_i32 = arith.constant 0 : i32
    %c0_i32_0 = arith.constant 0 : i32
    return %arg0, %c0_i32 : i32, i32
  }
  func.func @transform_1(%arg0: i32) -> (i32, i32) {
    %c0_i32 = arith.constant 0 : i32
    %c0_i32_0 = arith.constant 0 : i32
    %c0_i32_1 = arith.constant 0 : i32
    return %c0_i32, %c0_i32_0 : i32, i32
  }
  func.func @transform_2(%arg0: i32) -> (i32, i32) {
    %c0_i32 = arith.constant 0 : i32
    %c0_i32_0 = arith.constant 0 : i32
    %c0_i32_1 = arith.constant 0 : i32
    return %c0_i32, %c0_i32_0 : i32, i32
  }
  func.func @transform_3(%arg0: i32) -> (i32, i32) {
    %c0_i32 = arith.constant 0 : i32
    %c0_i32_0 = arith.constant 0 : i32
    %c0_i32_1 = arith.constant 0 : i32
    return %c0_i32, %c0_i32_0 : i32, i32
  }
  func.func @transform_4(%arg0: i32) -> (i32, i32) {
    %c0_i32 = arith.constant 0 : i32
    %c0_i32_0 = arith.constant 0 : i32
    %c0_i32_1 = arith.constant 0 : i32
    return %c0_i32, %c0_i32_0 : i32, i32
  }
  func.func @transform_5(%arg0: i32) -> (i32, i32) {
    %c0_i32 = arith.constant 0 : i32
    %c0_i32_0 = arith.constant 0 : i32
    %c0_i32_1 = arith.constant 0 : i32
    return %c0_i32, %c0_i32_0 : i32, i32
  }
  func.func @transform_6(%arg0: i32) -> (i32, i32) {
    %c0_i32 = arith.constant 0 : i32
    %c0_i32_0 = arith.constant 0 : i32
    return %arg0, %c0_i32 : i32, i32
  }
}

</mosaic_0001>

<bundles_post_ra>
// kernel: tpu_custom_call.1
= control target key start
LH: loop header
LB: loop body
LE: loop exit
PB: predicated region body
PF: predicated region fallthrough
CT: control target
= control target key end

     0   :  { %11 = vsyncpa [#allocation3], 0  ;;  %s3259_s0 = inlined_call_operand.hbm [shape: f32[256,64], index: 0, kind: input, shape index: {}]   ;;  %s3260_s1 = inlined_call_operand.hbm [shape: bf16[64,128], index: 1, kind: input, shape index: {}]   ;;  %s3261_s2 = inlined_call_operand.hbm [shape: bf16[128,128], index: 2, kind: input, shape index: {}]   ;;  %s3262_s3 = inlined_call_operand.hbm [shape: bf16[128,128], index: 3, kind: input, shape index: {}]   ;;  %s3263_s4 = inlined_call_operand.hbm [shape: bf16[128,128], index: 4, kind: input, shape index: {}]   ;;  %s3264_s5 = inlined_call_operand.hbm [shape: f32[6,128], index: 5, kind: input, shape index: {}]   ;;  %s3265_s6 = inlined_call_operand.hbm [shape: f32[256,128], index: 6, kind: output, shape index: {}]  }
   0x1   :  { %12 = vsyncpa [#allocation6], 0 }
   0x2   :  { %13 = vsyncpa [#allocation9], 0 }
   0x3   :  { %14 = vsyncpa [#allocation12], 0 }
   0x4   :  { %15 = vsyncpa [#allocation4], 0  ;;  %s2535_s21 = smov [#allocation5]   ;;  %s2371_s25 = scalar_lea.hbm %s3260_s1, 512 }
   0x5   :  { %s33_s22 = sshll.u32 %s2535_s21, 4  ;;  %p2372_p0 = scmp.ne.s32.totalorder %s3260_s1, %s2371_s25  ;;  %s34_s22 = int_to_ptr.vmem [resolvable:$true] %s33_s22 }
   0x6   :  { %p2375_p1 = scmp.lt.u32.totalorder %s2371_s25, %s3260_s1 }
   0x8   :  { %p2377_p2 = pnand %p2375_p1, %p2372_p0 }
   0xa   :  { %2380 = shalt.err (!%p2377_p2)
}
   0xb   :  { %s2381_s30 = scalar_lea.vmem %s34_s22, 512  ;;  %p2386_p4 = scmp.lt.s32.totalorder %s34_s22, %s34_s22 }
   0xc   :  { %p2382_p3 = scmp.ne.s32.totalorder %s34_s22, %s2381_s30  ;;  %p2387_p5 = scmp.lt.s32.totalorder %s2381_s30, %s2381_s30 }
   0xe   :  { %p2388_p6 = por %p2387_p5, %p2386_p4 }
  0x10   :  { %p2389_p7 = pnand %p2388_p6, %p2382_p3 }
  0x12   :  { %2392 = shalt.err (!%p2389_p7)
}
  0x13   :  { %s2536_s7 = smov 64   ;;  %s2537_s8 = smov 4  }
  0x14   :  { %39 = dma.hbm_to_vmem [thread:$0]  %s3260_s1, 512, %s34_s22, [#allocation6], %s2536_s7, %s2536_s7, %s2537_s8  }
  0x15   :  { %s2538_s11 = smov [#allocation8]   ;;  %s2539_s13 = smov [#allocation2]  }
  0x16   :  { %s57_s12 = sshll.u32 %s2538_s11, 4  ;;  %s21_s14 = sshll.u32 %s2539_s13, 4  ;;  %s58_s12 = int_to_ptr.vmem [resolvable:$true] %s57_s12  ;;  %s22_s14 = int_to_ptr.vmem [resolvable:$true] %s21_s14 }
  0x17   :  { %s2393_s17 = scalar_lea.hbm %s3262_s3, 1024 }
  0x18   :  { %p2394_p8 = scmp.ne.s32.totalorder %s3262_s3, %s2393_s17  ;;  %p2397_p9 = scmp.lt.u32.totalorder %s2393_s17, %s3262_s3 }
  0x1a   :  { %p2399_p10 = pnand %p2397_p9, %p2394_p8 }
  0x1c   :  { %2402 = shalt.err (!%p2399_p10)
}
  0x1d   :  { %s2403_s1 = scalar_lea.vmem %s58_s12, 1024  ;;  %p2408_p12 = scmp.lt.s32.totalorder %s58_s12, %s58_s12 }
  0x1e   :  { %p2404_p11 = scmp.ne.s32.totalorder %s58_s12, %s2403_s1  ;;  %p2409_p13 = scmp.lt.s32.totalorder %s2403_s1, %s2403_s1 }
  0x20   :  { %p2410_p0 = por %p2409_p13, %p2408_p12 }
  0x22   :  { %p2411_p1 = pnand %p2410_p0, %p2404_p11 }
  0x24   :  { %2414 = shalt.err (!%p2411_p1)
}
  0x25   :  { %63 = dma.hbm_to_vmem [thread:$0]  %s3262_s3, 1024, %s58_s12, [#allocation9], %s2536_s7, %s2536_s7, %s2537_s8  }
  0x26   :  { %s2415_s26 = scalar_lea.hbm %s3259_s0, 4096 }
  0x27   :  { %p2416_p2 = scmp.ne.s32.totalorder %s3259_s0, %s2415_s26  ;;  %p2419_p3 = scmp.lt.u32.totalorder %s2415_s26, %s3259_s0 }
  0x29   :  { %p2421_p4 = pnand %p2419_p3, %p2416_p2 }
  0x2b   :  { %2424 = shalt.err (!%p2421_p4)
}
  0x2c   :  { %s2425_s9 = scalar_lea.vmem %s22_s14, 4096  ;;  %p2430_p6 = scmp.lt.s32.totalorder %s22_s14, %s22_s14 }
  0x2d   :  { %p2426_p5 = scmp.ne.s32.totalorder %s22_s14, %s2425_s9  ;;  %p2431_p7 = scmp.lt.s32.totalorder %s2425_s9, %s2425_s9 }
  0x2f   :  { %p2432_p8 = por %p2431_p7, %p2430_p6 }
  0x31   :  { %p2433_p9 = pnand %p2432_p8, %p2426_p5 }
  0x33   :  { %2436 = shalt.err (!%p2433_p9)
}
  0x34   :  { %s2540_s3 = smov 128   ;;  %s2541_s10 = smov 8  }
  0x35   :  { %27 = dma.hbm_to_vmem [thread:$0]  %s3259_s0, 4096, %s22_s14, [#allocation3], %s2540_s3, %s2540_s3, %s2541_s10  }
  0x36   :  { %s2542_s13 = smov [#allocation7]   ;;  %s2543_s16 = smov [#allocation10]  }
  0x37   :  { %s45_s15 = sshll.u32 %s2542_s13, 4  ;;  %s69_s17 = sshll.u32 %s2543_s16, 4  ;;  %s46_s15 = int_to_ptr.vmem [resolvable:$true] %s45_s15  ;;  %s70_s17 = int_to_ptr.vmem [resolvable:$true] %s69_s17 }
  0x38   :  { %s2437_s20 = scalar_lea.hbm %s3261_s2, 1024 }
  0x39   :  { %p2438_p10 = scmp.ne.s32.totalorder %s3261_s2, %s2437_s20  ;;  %p2441_p11 = scmp.lt.u32.totalorder %s2437_s20, %s3261_s2 }
  0x3b   :  { %p2443_p12 = pnand %p2441_p11, %p2438_p10 }
  0x3d   :  { %2446 = shalt.err (!%p2443_p12)
}
  0x3e   :  { %s2447_s0 = scalar_lea.vmem %s46_s15, 1024  ;;  %p2452_p0 = scmp.lt.s32.totalorder %s46_s15, %s46_s15 }
  0x3f   :  { %p2448_p13 = scmp.ne.s32.totalorder %s46_s15, %s2447_s0  ;;  %p2453_p1 = scmp.lt.s32.totalorder %s2447_s0, %s2447_s0 }
  0x41   :  { %p2454_p2 = por %p2453_p1, %p2452_p0 }
  0x43   :  { %p2455_p3 = pnand %p2454_p2, %p2448_p13 }
  0x45   :  { %2458 = shalt.err (!%p2455_p3)
}
  0x46   :  { %51 = dma.hbm_to_vmem [thread:$0]  %s3261_s2, 1024, %s46_s15, [#allocation6], %s2536_s7, %s2536_s7, %s2537_s8  }
  0x47   :  { %s2459_s27 = scalar_lea.hbm %s3263_s4, 1024 }
  0x48   :  { %p2460_p4 = scmp.ne.s32.totalorder %s3263_s4, %s2459_s27  ;;  %p2463_p5 = scmp.lt.u32.totalorder %s2459_s27, %s3263_s4 }
  0x4a   :  { %p2465_p6 = pnand %p2463_p5, %p2460_p4 }
  0x4c   :  { %2468 = shalt.err (!%p2465_p6)
}
  0x4d   :  { %s2469_s11 = scalar_lea.vmem %s70_s17, 1024  ;;  %p2474_p8 = scmp.lt.s32.totalorder %s70_s17, %s70_s17 }
  0x4e   :  { %p2470_p7 = scmp.ne.s32.totalorder %s70_s17, %s2469_s11  ;;  %p2475_p9 = scmp.lt.s32.totalorder %s2469_s11, %s2469_s11 }
  0x50   :  { %p2476_p10 = por %p2475_p9, %p2474_p8 }
  0x52   :  { %p2477_p11 = pnand %p2476_p10, %p2470_p7 }
  0x54   :  { %2480 = shalt.err (!%p2477_p11)
}
  0x55   :  { %75 = dma.hbm_to_vmem [thread:$0]  %s3263_s4, 1024, %s70_s17, [#allocation9], %s2536_s7, %s2536_s7, %s2537_s8  }
  0x56   :  { %s2544_s13 = smov [#allocation11]   ;;  %s2481_s19 = scalar_lea.hbm %s3264_s5, 128 }
  0x57   :  { %s82_s15 = sshll.u32 %s2544_s13, 4  ;;  %p2482_p12 = scmp.ne.s32.totalorder %s3264_s5, %s2481_s19  ;;  %s83_s15 = int_to_ptr.vmem [resolvable:$true] %s82_s15 }
  0x58   :  { %p2485_p13 = scmp.lt.u32.totalorder %s2481_s19, %s3264_s5 }
  0x5a   :  { %p2487_p0 = pnand %p2485_p13, %p2482_p12 }
  0x5c   :  { %2490 = shalt.err (!%p2487_p0)
}
  0x5d   :  { %s2491_s23 = scalar_lea.vmem %s83_s15, 128  ;;  %p2496_p2 = scmp.lt.s32.totalorder %s83_s15, %s83_s15 }
  0x5e   :  { %p2492_p1 = scmp.ne.s32.totalorder %s83_s15, %s2491_s23  ;;  %p2497_p3 = scmp.lt.s32.totalorder %s2491_s23, %s2491_s23 }
  0x60   :  { %p2498_p4 = por %p2497_p3, %p2496_p2 }
  0x62   :  { %p2499_p5 = pnand %p2498_p4, %p2492_p1 }
  0x64   :  { %2502 = shalt.err (!%p2499_p5)
}
  0x65   :  { %85 = dma.hbm_to_vmem [thread:$0]  %s3264_s5, 128, %s83_s15, [#allocation12]  }
  0x66   :  { %2525 = dma.done.wait [#allocation3], 4096  }
  0x67   :  { %2526 = vsyncadd [#allocation3], 4294963200 }
  0x68   :  { %2527 = dma.done.wait [#allocation6], 1536  }
  0x69   :  { %2528 = vsyncadd [#allocation6], 4294965760 }
  0x6a   :  { %2529 = dma.done.wait [#allocation9], 2048  }
  0x6b   :  { %2530 = vsyncadd [#allocation9], 4294965248 }
  0x6c   :  { %2531 = dma.done.wait [#allocation12], 128  }
  0x6d   :  { %2532 = vsyncadd [#allocation12], 4294967168  ;;  %v2150_v0 = vld [vmem:[#allocation5] sm:$0xff]   ;;  %v2151_v1 = vld [vmem:[#allocation5 + $0x8] sm:$0xff]   ;;  %vm190_vm0 = vcmask 523264   ;;  %v162_v52 = vlaneseq  ;;  %s2545_s5 = smov [#allocation13]  }
  0x6e   :  { %1939 = vmatprep.subr.bf16.mxu0 %v2150_v0  ;;  %v2152_v2 = vld [vmem:[#allocation5 + $0x10] sm:$0xff]   ;;  %v105_v3 = vld [vmem:[#allocation2] sm:$0xff]  ;;  %v106_v4 = vld [vmem:[#allocation2 + $0x8] sm:$0xff]  ;;  %s1788_s8 = sshll.u32 %s2545_s5, 4  ;;  %s1789_s8 = int_to_ptr.vmem [resolvable:$true] %s1788_s8 }
  0x6f   :  { %1940 = vmatpush3.bf16.msra.mxu0 %v2150_v0  ;;  %v137_v5 = vpack.c.bf16 %v106_v4, %v105_v3  ;;  %v2153_v6 = vld [vmem:[#allocation5 + $0x18] sm:$0xff]   ;;  %v107_v7 = vld [vmem:[#allocation2 + $0x10] sm:$0xff]  ;;  %v109_v9 = vld [vmem:[#allocation2 + $0x20] sm:$0xff]  ;;  %v2684_v53 = vshrl.u32 %v162_v52, 7  ;;  %s2503_s17 = scalar_lea.vmem %s1789_s8, 4096  ;;  %p2508_p7 = scmp.lt.s32.totalorder %s1789_s8, %s1789_s8 }
  0x70   :  { %1941 = vmatprep.subr.bf16.mxu0 %v2151_v1  ;;  %v108_v8 = vld [vmem:[#allocation2 + $0x18] sm:$0xff]  ;;  %v110_v10 = vld [vmem:[#allocation2 + $0x28] sm:$0xff]  ;;  %v111_v13 = vld [vmem:[#allocation2 + $0x30] sm:$0xff]  ;;  %p2504_p6 = scmp.ne.s32.totalorder %s1789_s8, %s2503_s17  ;;  %p2509_p8 = scmp.lt.s32.totalorder %s2503_s17, %s2503_s17 }
  0x71   :  { %1947 = vmatprep.mubr.msk.bf16.mxu0 %vm190_vm0, %v137_v5  ;;  %v138_v11 = vpack.c.bf16 %v108_v8, %v107_v7  ;;  %v139_v12 = vpack.c.bf16 %v110_v10, %v109_v9  ;;  %v112_v14 = vld [vmem:[#allocation2 + $0x38] sm:$0xff]  ;;  %v113_v15 = vld [vmem:[#allocation2 + $0x40] sm:$0xff]  ;;  %v114_v16 = vld [vmem:[#allocation2 + $0x48] sm:$0xff]  ;;  %v164_v54 = vsub.s32 0, %v2684_v53 }
  0x72   :  { %v140_v17 = vpack.c.bf16 %v112_v14, %v111_v13  ;;  %v141_v18 = vpack.c.bf16 %v114_v16, %v113_v15  ;;  %v115_v19 = vld [vmem:[#allocation2 + $0x50] sm:$0xff]  ;;  %v116_v20 = vld [vmem:[#allocation2 + $0x58] sm:$0xff]  ;;  %v117_v21 = vld [vmem:[#allocation2 + $0x60] sm:$0xff]  ;;  %p2510_p9 = por %p2509_p8, %p2508_p7 }
  0x73   :  { %1942 = vmatpush3.bf16.msra.mxu0 %v2151_v1  ;;  %v118_v22 = vld [vmem:[#allocation2 + $0x68] sm:$0xff]  ;;  %v142_v23 = vpack.c.bf16 %v116_v20, %v115_v19  ;;  %v119_v25 = vld [vmem:[#allocation2 + $0x70] sm:$0xff]  ;;  %v120_v26 = vld [vmem:[#allocation2 + $0x78] sm:$0xff] }
  0x74   :  { %1943 = vmatprep.subr.bf16.mxu0 %v2152_v2  ;;  %v143_v24 = vpack.c.bf16 %v118_v22, %v117_v21  ;;  %v121_v27 = vld [vmem:[#allocation2 + $0x80] sm:$0xff]  ;;  %v122_v28 = vld [vmem:[#allocation2 + $0x88] sm:$0xff]  ;;  %v144_v29 = vpack.c.bf16 %v120_v26, %v119_v25  ;;  %v123_v31 = vld [vmem:[#allocation2 + $0x90] sm:$0xff]  ;;  %p2511_p10 = pnand %p2510_p9, %p2504_p6 }
  0x75   :  { %v145_v30 = vpack.c.bf16 %v122_v28, %v121_v27  ;;  %v124_v32 = vld [vmem:[#allocation2 + $0x98] sm:$0xff]  ;;  %v125_v33 = vld [vmem:[#allocation2 + $0xa0] sm:$0xff]  ;;  %v126_v34 = vld [vmem:[#allocation2 + $0xa8] sm:$0xff] }
  0x76   :  { %v146_v35 = vpack.c.bf16 %v124_v32, %v123_v31  ;;  %v147_v36 = vpack.c.bf16 %v126_v34, %v125_v33  ;;  %v127_v37 = vld [vmem:[#allocation2 + $0xb0] sm:$0xff]  ;;  %v128_v38 = vld [vmem:[#allocation2 + $0xb8] sm:$0xff]  ;;  %v129_v39 = vld [vmem:[#allocation2 + $0xc0] sm:$0xff] }
  0x77   :  { %1944 = vmatpush3.bf16.msra.mxu0 %v2152_v2  ;;  %v130_v40 = vld [vmem:[#allocation2 + $0xc8] sm:$0xff]  ;;  %v148_v41 = vpack.c.bf16 %v128_v38, %v127_v37  ;;  %v131_v43 = vld [vmem:[#allocation2 + $0xd0] sm:$0xff]  ;;  %v132_v44 = vld [vmem:[#allocation2 + $0xd8] sm:$0xff] }
  0x78   :  { %1945 = vmatprep.subr.bf16.mxu0 %v2153_v6  ;;  %v149_v42 = vpack.c.bf16 %v130_v40, %v129_v39  ;;  %v133_v45 = vld [vmem:[#allocation2 + $0xe0] sm:$0xff]  ;;  %v134_v46 = vld [vmem:[#allocation2 + $0xe8] sm:$0xff]  ;;  %v150_v47 = vpack.c.bf16 %v132_v44, %v131_v43  ;;  %v135_v49 = vld [vmem:[#allocation2 + $0xf0] sm:$0xff] }
  0x79   :  { %v151_v48 = vpack.c.bf16 %v134_v46, %v133_v45  ;;  %v136_v50 = vld [vmem:[#allocation2 + $0xf8] sm:$0xff]  ;;  %v2687_v55 = vld [vmem:[#allocation11] sm:$0x3f]  ;;  %v2155_v37 = vld [vmem:[#allocation7 + $0x8] sm:$0xff]  }
  0x7a   :  { %v152_v51 = vpack.c.bf16 %v136_v50, %v135_v49  ;;  %v2690_v56 = vrot.slane %v2687_v55, %v164_v54  ;;  %v2156_v43 = vld [vmem:[#allocation7 + $0x10] sm:$0xff]  }
  0x7b   :  { %1946 = vmatpush3.bf16.msra.mxu0 %v2153_v6 }
  0x7e   :  { %1948 = vmatmul.mubr.msk.bf16.vlgmr.msra.gmra.mrb[0].mxu0 %vm190_vm0, %v138_v11 }
  0x7f   :  { %1951 = vmatprep.mubr.msk.bf16.mxu0 %vm190_vm0, %v139_v12 }
  0x86   :  { %1952 = vmatmul.mubr.msk.bf16.gmra.mrb[4].mxu0 %vm190_vm0, %v140_v17 }
  0x87   :  { %1955 = vmatprep.mubr.msk.bf16.mxu0 %vm190_vm0, %v141_v18 }
  0x8e   :  { %1956 = vmatmul.mubr.msk.bf16.gmra.mrb[8].mxu0 %vm190_vm0, %v142_v23 }
  0x8f   :  { %1959 = vmatprep.mubr.msk.bf16.mxu0 %vm190_vm0, %v143_v24 }
  0x96   :  { %1960 = vmatmul.mubr.msk.bf16.gmra.mrb[12].mxu0 %vm190_vm0, %v144_v29  ;;  %v2154_v29 = vld [vmem:[#allocation7] sm:$0xff]  }
  0x97   :  { %1963 = vmatprep.mubr.msk.bf16.mxu0 %vm190_vm0, %v145_v30  ;;  %1979 = vmatprep.subr.bf16.mxu1 %v2154_v29 }
  0x98   :  { %1980 = vmatpush3.bf16.msra.mxu1 %v2154_v29 }
  0x99   :  { %1981 = vmatprep.subr.bf16.mxu1 %v2155_v37 }
  0x9c   :  { %1982 = vmatpush3.bf16.msra.mxu1 %v2155_v37 }
  0x9d   :  { %1983 = vmatprep.subr.bf16.mxu1 %v2156_v43 }
  0x9e   :  { %1964 = vmatmul.mubr.msk.bf16.gmra.mrb[16].mxu0 %vm190_vm0, %v146_v35 }
  0x9f   :  { %1967 = vmatprep.mubr.msk.bf16.mxu0 %vm190_vm0, %v147_v36 }
  0xa0   :  { %1984 = vmatpush3.bf16.msra.mxu1 %v2156_v43 }
  0xa6   :  { %1968 = vmatmul.mubr.msk.bf16.gmra.mrb[20].mxu0 %vm190_vm0, %v148_v41 }
  0xa7   :  { %1971 = vmatprep.mubr.msk.bf16.mxu0 %vm190_vm0, %v149_v42 }
  0xae   :  { %1972 = vmatmul.mubr.msk.bf16.gmra.mrb[24].mxu0 %vm190_vm0, %v150_v47 }
  0xaf   :  { %1975 = vmatprep.mubr.msk.bf16.mxu0 %vm190_vm0, %v151_v48 }
  0xb6   :  { %1976 = vmatmul.mubr.msk.bf16.gmra.mrb[28].mxu0 %vm190_vm0, %v152_v51  ;;  %v2157_v51 = vld [vmem:[#allocation7 + $0x18] sm:$0xff]  }
  0xb7   :  { %1985 = vmatprep.subr.bf16.mxu1 %v2157_v51 }
  0xb8   :  { %1986 = vmatpush3.bf16.msra.mxu1 %v2157_v51 }
 0x151   :  { %v1949_v57 = vpop.f32.mrb[0].mxu0 }
 0x152   :  { %v2693_v58 = vadd.f32 %v1949_v57, %v2690_v56  ;;  %v273_v59 = vpop.f32.mrb[1].mxu0 }
 0x153   :  { %v2696_v60 = vadd.f32 %v273_v59, %v2690_v56  ;;  %v1950_v61 = vpop.f32.mrb[2].mxu0 }
 0x154   :  { %404 = vadd.xlane.f32.xlu1 %v2693_v58  ;;  %v276_v62 = vpop.f32.mrb[3].mxu0  ;;  %v2701_v63 = vadd.f32 %v1950_v61, %v2690_v56  ;;  %v466_v0 = vmul.f32 %v2693_v58, %v2693_v58 }
 0x155   :  { %400 = vadd.xlane.f32.xlu0 %v2696_v60  ;;  %v2707_v2 = vadd.f32 %v276_v62, %v2690_v56  ;;  %v464_v8 = vmul.f32 %v2696_v60, %v2696_v60  ;;  %v2158_v62 = vld [vmem:[#allocation7 + $0x20] sm:$0xff]  }
 0x156   :  { %v467_v3 = vmul.f32 %v2701_v63, %v2701_v63  ;;  %1987 = vmatprep.subr.bf16.mxu1 %v2158_v62 }
 0x157   :  { %v465_v7 = vmul.f32 %v2707_v2, %v2707_v2  ;;  %1988 = vmatpush3.bf16.msra.mxu1 %v2158_v62 }
 0x158   :  { %406 = vadd.xlane.f32.xlu1 %v2701_v63 }
 0x159   :  { %500 = vadd.xlane.f32.xlu0 %v466_v0  ;;  %v1953_v1 = vpop.f32.mrb[4].mxu0 }
 0x15a   :  { %v289_v4 = vpop.f32.mrb[5].mxu0  ;;  %v2720_v12 = vadd.f32 %v1953_v1, %v2690_v56 }
 0x15b   :  { %v1954_v5 = vpop.f32.mrb[6].mxu0  ;;  %v2728_v16 = vadd.f32 %v289_v4, %v2690_v56 }
 0x15c   :  { %502 = vadd.xlane.f32.xlu1 %v467_v3  ;;  %v292_v6 = vpop.f32.mrb[7].mxu0  ;;  %v2717_v9 = vadd.f32 %v1954_v5, %v2690_v56  ;;  %v470_v20 = vmul.f32 %v2720_v12, %v2720_v12 }
 0x15d   :  { %402 = vadd.xlane.f32.xlu0 %v2707_v2  ;;  %v2725_v15 = vadd.f32 %v292_v6, %v2690_v56  ;;  %v468_v24 = vmul.f32 %v2728_v16, %v2728_v16 }
 0x15e   :  { %v471_v18 = vmul.f32 %v2717_v9, %v2717_v9 }
 0x15f   :  { %v469_v23 = vmul.f32 %v2725_v15, %v2725_v15 }
 0x160   :  { %498 = vadd.xlane.f32.xlu1 %v465_v7 }
 0x161   :  { %496 = vadd.xlane.f32.xlu0 %v464_v8  ;;  %v1957_v10 = vpop.f32.mrb[8].mxu0  ;;  %v2159_v8 = vld [vmem:[#allocation7 + $0x28] sm:$0xff]  }
 0x162   :  { %v305_v11 = vpop.f32.mrb[9].mxu0  ;;  %v2751_v30 = vadd.f32 %v1957_v10, %v2690_v56  ;;  %1989 = vmatprep.subr.bf16.mxu1 %v2159_v8 }
 0x163   :  { %v1958_v13 = vpop.f32.mrb[10].mxu0  ;;  %v2768_v38 = vadd.f32 %v305_v11, %v2690_v56  ;;  %1990 = vmatpush3.bf16.msra.mxu1 %v2159_v8 }
 0x164   :  { %414 = vadd.xlane.f32.xlu1 %v2717_v9  ;;  %v308_v14 = vpop.f32.mrb[11].mxu0  ;;  %v2745_v25 = vadd.f32 %v1958_v13, %v2690_v56  ;;  %v474_v44 = vmul.f32 %v2751_v30, %v2751_v30 }
 0x165   :  { %412 = vadd.xlane.f32.xlu0 %v2720_v12  ;;  %v2765_v36 = vadd.f32 %v308_v14, %v2690_v56  ;;  %v472_v52 = vmul.f32 %v2768_v38, %v2768_v38 }
 0x166   :  { %v475_v40 = vmul.f32 %v2745_v25, %v2745_v25 }
 0x167   :  { %v473_v50 = vmul.f32 %v2765_v36, %v2765_v36 }
 0x168   :  { %410 = vadd.xlane.f32.xlu1 %v2725_v15 }
 0x169   :  { %408 = vadd.xlane.f32.xlu0 %v2728_v16  ;;  %v1961_v17 = vpop.f32.mrb[12].mxu0 }
 0x16a   :  { %v2734_v19 = vpop.f32.mrb[13].mxu0  ;;  %v2799_v0 = vadd.f32 %v1961_v17, %v2690_v56 }
 0x16b   :  { %v1962_v21 = vpop.f32.mrb[14].mxu0  ;;  %v2818_v10 = vadd.f32 %v2734_v19, %v2690_v56 }
 0x16c   :  { %510 = vadd.xlane.f32.xlu1 %v471_v18  ;;  %v2738_v22 = vpop.f32.mrb[15].mxu0  ;;  %v2793_v54 = vadd.f32 %v1962_v21, %v2690_v56  ;;  %v2160_v18 = vld [vmem:[#allocation7 + $0x30] sm:$0xff]  }
 0x16d   :  { %508 = vadd.xlane.f32.xlu0 %v470_v20  ;;  %v2814_v7 = vadd.f32 %v2738_v22, %v2690_v56  ;;  %v478_v20 = vmul.f32 %v2799_v0, %v2799_v0  ;;  %1991 = vmatprep.subr.bf16.mxu1 %v2160_v18  ;;  %v476_v29 = vmul.f32 %v2818_v10, %v2818_v10 }
 0x16e   :  { %v479_v13 = vmul.f32 %v2793_v54, %v2793_v54  ;;  %1992 = vmatpush3.bf16.msra.mxu1 %v2160_v18 }
 0x170   :  { %506 = vadd.xlane.f32.xlu1 %v469_v23 }
 0x171   :  { %504 = vadd.xlane.f32.xlu0 %v468_v24  ;;  %v1965_v26 = vpop.f32.mrb[16].mxu0 }
 0x172   :  { %v2748_v27 = vadd.f32 %v1965_v26, %v2690_v56  ;;  %v337_v28 = vpop.f32.mrb[17].mxu0  ;;  %v477_v26 = vmul.f32 %v2814_v7, %v2814_v7 }
 0x173   :  { %v2754_v31 = vadd.f32 %v337_v28, %v2690_v56  ;;  %v1966_v32 = vpop.f32.mrb[18].mxu0  ;;  %v2161_v28 = vld [vmem:[#allocation7 + $0x38] sm:$0xff]  }
 0x174   :  { %422 = vadd.xlane.f32.xlu1 %v2745_v25  ;;  %v2758_v33 = vadd.f32 %v1966_v32, %v2690_v56  ;;  %v340_v34 = vpop.f32.mrb[19].mxu0  ;;  %1993 = vmatprep.subr.bf16.mxu1 %v2161_v28  ;;  %v482_v32 = vmul.f32 %v2748_v27, %v2748_v27 }
 0x175   :  { %420 = vadd.xlane.f32.xlu0 %v2751_v30  ;;  %v2762_v35 = vadd.f32 %v340_v34, %v2690_v56  ;;  %1994 = vmatpush3.bf16.msra.mxu1 %v2161_v28  ;;  %v480_v37 = vmul.f32 %v2754_v31, %v2754_v31 }
 0x177   :  { %v481_v34 = vmul.f32 %v2762_v35, %v2762_v35 }
 0x178   :  { %418 = vadd.xlane.f32.xlu1 %v2765_v36 }
 0x179   :  { %416 = vadd.xlane.f32.xlu0 %v2768_v38  ;;  %v1969_v39 = vpop.f32.mrb[20].mxu0 }
 0x17a   :  { %v2775_v41 = vadd.f32 %v1969_v39, %v2690_v56  ;;  %v353_v42 = vpop.f32.mrb[21].mxu0 }
 0x17b   :  { %v2780_v45 = vadd.f32 %v353_v42, %v2690_v56  ;;  %v1970_v46 = vpop.f32.mrb[22].mxu0 }
 0x17c   :  { %518 = vadd.xlane.f32.xlu1 %v475_v40  ;;  %v2783_v47 = vadd.f32 %v1970_v46, %v2690_v56  ;;  %v356_v48 = vpop.f32.mrb[23].mxu0  ;;  %v486_v40 = vmul.f32 %v2775_v41, %v2775_v41 }
 0x17d   :  { %516 = vadd.xlane.f32.xlu0 %v474_v44  ;;  %v2786_v49 = vadd.f32 %v356_v48, %v2690_v56  ;;  %v484_v43 = vmul.f32 %v2780_v45, %v2780_v45 }
 0x17e   :  { %v487_v39 = vmul.f32 %v2783_v47, %v2783_v47 }
 0x17f   :  { %v485_v42 = vmul.f32 %v2786_v49, %v2786_v49 }
 0x180   :  { %514 = vadd.xlane.f32.xlu1 %v473_v50 }
 0x181   :  { %512 = vadd.xlane.f32.xlu0 %v472_v52  ;;  %v1973_v57 = vpop.f32.mrb[24].mxu0 }
 0x182   :  { %v2796_v59 = vadd.f32 %v1973_v57, %v2690_v56  ;;  %v369_v61 = vpop.f32.mrb[25].mxu0 }
 0x183   :  { %v2802_v1 = vadd.f32 %v369_v61, %v2690_v56  ;;  %v1974_v3 = vpop.f32.mrb[26].mxu0 }
 0x184   :  { %430 = vadd.xlane.f32.xlu1 %v2793_v54  ;;  %v2806_v4 = vadd.f32 %v1974_v3, %v2690_v56  ;;  %v372_v5 = vpop.f32.mrb[27].mxu0  ;;  %v490_v46 = vmul.f32 %v2796_v59, %v2796_v59 }
 0x185   :  { %428 = vadd.xlane.f32.xlu0 %v2799_v0  ;;  %v2810_v6 = vadd.f32 %v372_v5, %v2690_v56  ;;  %v488_v50 = vmul.f32 %v2802_v1, %v2802_v1 }
 0x186   :  { %v491_v44 = vmul.f32 %v2806_v4, %v2806_v4 }
 0x187   :  { %v489_v48 = vmul.f32 %v2810_v6, %v2810_v6 }
 0x188   :  { %426 = vadd.xlane.f32.xlu1 %v2814_v7 }
 0x189   :  { %424 = vadd.xlane.f32.xlu0 %v2818_v10  ;;  %v1977_v11 = vpop.f32.mrb[28].mxu0 }
 0x18a   :  { %v2825_v14 = vadd.f32 %v1977_v11, %v2690_v56  ;;  %v385_v17 = vpop.f32.mrb[29].mxu0 }
 0x18b   :  { %v2830_v19 = vadd.f32 %v385_v17, %v2690_v56  ;;  %v1978_v21 = vpop.f32.mrb[30].mxu0 }
 0x18c   :  { %526 = vadd.xlane.f32.xlu1 %v479_v13  ;;  %v2833_v22 = vadd.f32 %v1978_v21, %v2690_v56  ;;  %v388_v23 = vpop.f32.mrb[31].mxu0  ;;  %v494_v61 = vmul.f32 %v2825_v14, %v2825_v14 }
 0x18d   :  { %524 = vadd.xlane.f32.xlu0 %v478_v20  ;;  %v2836_v24 = vadd.f32 %v388_v23, %v2690_v56  ;;  %v483_v56 = vmul.f32 %v2758_v33, %v2758_v33  ;;  %v492_v52 = vmul.f32 %v2830_v19, %v2830_v19 }
 0x18e   :  { %v495_v57 = vmul.f32 %v2833_v22, %v2833_v22 }
 0x18f   :  { %v493_v51 = vmul.f32 %v2836_v24, %v2836_v24 }
 0x190   :  { %522 = vadd.xlane.f32.xlu1 %v477_v26 }
 0x191   :  { %520 = vadd.xlane.f32.xlu0 %v476_v29 }
 0x194   :  { %438 = vadd.xlane.f32.xlu1 %v2758_v33 }
 0x195   :  { %436 = vadd.xlane.f32.xlu0 %v2748_v27 }
 0x198   :  { %434 = vadd.xlane.f32.xlu1 %v2762_v35 }
 0x199   :  { %432 = vadd.xlane.f32.xlu0 %v2754_v31 }
 0x19c   :  { %534 = vadd.xlane.f32.xlu1 %v483_v56 }
 0x19d   :  { %532 = vadd.xlane.f32.xlu0 %v482_v32 }
 0x1a0   :  { %530 = vadd.xlane.f32.xlu1 %v481_v34 }
 0x1a1   :  { %528 = vadd.xlane.f32.xlu0 %v480_v37 }
 0x1a4   :  { %446 = vadd.xlane.f32.xlu1 %v2783_v47 }
 0x1a5   :  { %444 = vadd.xlane.f32.xlu0 %v2775_v41 }
 0x1a8   :  { %442 = vadd.xlane.f32.xlu1 %v2786_v49 }
 0x1a9   :  { %440 = vadd.xlane.f32.xlu0 %v2780_v45 }
 0x1ac   :  { %542 = vadd.xlane.f32.xlu1 %v487_v39 }
 0x1ad   :  { %540 = vadd.xlane.f32.xlu0 %v486_v40 }
 0x1b0   :  { %538 = vadd.xlane.f32.xlu1 %v485_v42 }
 0x1b1   :  { %536 = vadd.xlane.f32.xlu0 %v484_v43 }
 0x1b4   :  { %454 = vadd.xlane.f32.xlu1 %v2806_v4 }
 0x1b5   :  { %452 = vadd.xlane.f32.xlu0 %v2796_v59 }
 0x1b8   :  { %450 = vadd.xlane.f32.xlu1 %v2810_v6 }
 0x1b9   :  { %448 = vadd.xlane.f32.xlu0 %v2802_v1 }
 0x1bc   :  { %550 = vadd.xlane.f32.xlu1 %v491_v44 }
 0x1bd   :  { %548 = vadd.xlane.f32.xlu0 %v490_v46 }
 0x1c0   :  { %546 = vadd.xlane.f32.xlu1 %v489_v48 }
 0x1c1   :  { %544 = vadd.xlane.f32.xlu0 %v488_v50 }
 0x1c4   :  { %462 = vadd.xlane.f32.xlu1 %v2833_v22 }
 0x1c5   :  { %460 = vadd.xlane.f32.xlu0 %v2825_v14 }
 0x1c8   :  { %458 = vadd.xlane.f32.xlu1 %v2836_v24 }
 0x1c9   :  { %456 = vadd.xlane.f32.xlu0 %v2830_v19 }
 0x1cc   :  { %554 = vadd.xlane.f32.xlu1 %v493_v51 }
 0x1cd   :  { %552 = vadd.xlane.f32.xlu0 %v492_v52 }
 0x1d0   :  { %558 = vadd.xlane.f32.xlu1 %v495_v57 }
 0x1d1   :  { %556 = vadd.xlane.f32.xlu0 %v494_v61 }
 0x1e1   :  { %v405_v62 = vpop.xlane.xlu1 %404 }
 0x1e2   :  { %v401_v3 = vpop.xlane.xlu0 %400  ;;  %v562_v5 = vmul.f32 0.015625, %v405_v62 }
 0x1e3   :  { %v560_v29 = vmul.f32 0.015625, %v401_v3 }
 0x1e4   :  { %v626_v17 = vmul.f32 %v562_v5, %v562_v5 }
 0x1e5   :  { %v407_v8 = vpop.xlane.xlu1 %406  ;;  %v624_v44 = vmul.f32 %v560_v29, %v560_v29 }
 0x1e6   :  { %v563_v11 = vmul.f32 0.015625, %v407_v8  ;;  %v501_v13 = vpop.xlane.xlu0 %500 }
 0x1e7   :  { %v594_v18 = vmul.f32 0.015625, %v501_v13  ;;  %v818_v13 = vsub.s32 1, %v2684_v53 }
 0x1e8   :  { %v627_v23 = vmul.f32 %v563_v11, %v563_v11 }
 0x1e9   :  { %v658_v20 = vsub.f32 %v594_v18, %v626_v17  ;;  %v503_v21 = vpop.xlane.xlu1 %502  ;;  %v854_v18 = vsub.s32 2, %v2684_v53 }
 0x1ea   :  { %v595_v26 = vmul.f32 0.015625, %v503_v21  ;;  %v403_v28 = vpop.xlane.xlu0 %402  ;;  %v690_v21 = vsub.f32 %v2693_v58, %v562_v5 }
 0x1eb   :  { %v722_v56 = vadd.f32 1e-05, %v658_v20  ;;  %v561_v32 = vmul.f32 0.015625, %v403_v28 }
 0x1ec   :  { %v659_v34 = vsub.f32 %v595_v26, %v627_v23  ;;  %v691_v23 = vsub.f32 %v2701_v63, %v563_v11 }
 0x1ed   :  { %v625_v37 = vmul.f32 %v561_v32, %v561_v32  ;;  %v499_v39 = vpop.xlane.xlu1 %498  ;;  %2178 = vrsqrt.f32 %v722_v56 }
 0x1ee   :  { %v723_v40 = vadd.f32 1e-05, %v659_v34  ;;  %v593_v42 = vmul.f32 0.015625, %v499_v39  ;;  %v497_v43 = vpop.xlane.xlu0 %496 }
 0x1ef   :  { %v592_v46 = vmul.f32 0.015625, %v497_v43 }
 0x1f0   :  { %2180 = vrsqrt.f32 %v723_v40  ;;  %v657_v48 = vsub.f32 %v593_v42, %v625_v37  ;;  %v2905_v42 = vrot.slane %v2687_v55, %v818_v13 }
 0x1f1   :  { %v656_v50 = vsub.f32 %v592_v46, %v624_v44  ;;  %v415_v51 = vpop.xlane.xlu1 %414  ;;  %v2910_v44 = vrot.slane %v2687_v55, %v854_v18  ;;  %v688_v46 = vsub.f32 %v2696_v60, %v560_v29 }
 0x1f2   :  { %v721_v52 = vadd.f32 1e-05, %v657_v48  ;;  %v413_v57 = vpop.xlane.xlu0 %412  ;;  %v2890_v3 = vmul.f32 0.015625, %v415_v51 }
 0x1f3   :  { %v720_v61 = vadd.f32 1e-05, %v656_v50  ;;  %v2893_v17 = vmul.f32 0.015625, %v413_v57  ;;  %v689_v50 = vsub.f32 %v2707_v2, %v561_v32 }
 0x1f4   :  { %2182 = vrsqrt.f32 %v721_v52  ;;  %v631_v56 = vmul.f32 %v2890_v3, %v2890_v3 }
 0x1f5   :  { %2184 = vrsqrt.f32 %v720_v61  ;;  %v411_v62 = vpop.xlane.xlu1 %410  ;;  %v630_v58 = vmul.f32 %v2893_v17, %v2893_v17 }
 0x1f6   :  { %v409_v8 = vpop.xlane.xlu0 %408  ;;  %v2900_v34 = vmul.f32 0.015625, %v411_v62 }
 0x1f7   :  { %v2179_v20 = vpop.eup %2178  ;;  %v2902_v37 = vmul.f32 0.015625, %v409_v8 }
 0x1f8   :  { %v786_v63 = vmul.f32 %v2179_v20, %v690_v21  ;;  %v629_v61 = vmul.f32 %v2900_v34, %v2900_v34 }
 0x1f9   :  { %v511_v26 = vpop.xlane.xlu1 %510  ;;  %v628_v62 = vmul.f32 %v2902_v37, %v2902_v37 }
 0x1fa   :  { %v2181_v28 = vpop.eup %2180  ;;  %v599_v39 = vmul.f32 0.015625, %v511_v26  ;;  %v509_v40 = vpop.xlane.xlu0 %508  ;;  %v822_v2 = vmul.f32 %v2905_v42, %v786_v63 }
 0x1fb   :  { %v787_v43 = vmul.f32 %v2181_v28, %v691_v23  ;;  %v598_v5 = vmul.f32 0.015625, %v509_v40 }
 0x1fc   :  { %v663_v11 = vsub.f32 %v599_v39, %v631_v56 }
 0x1fd   :  { %v823_v48 = vmul.f32 %v2905_v42, %v787_v43  ;;  %v662_v51 = vsub.f32 %v598_v5, %v630_v58  ;;  %v507_v52 = vpop.xlane.xlu1 %506 }
 0x1fe   :  { %v2183_v57 = vpop.eup %2182  ;;  %v727_v8 = vadd.f32 1e-05, %v663_v11  ;;  %v597_v13 = vmul.f32 0.015625, %v507_v52  ;;  %v505_v20 = vpop.xlane.xlu0 %504  ;;  %v2162_v11 = vld [vmem:[#allocation8] sm:$0xff]  }
 0x1ff   :  { %v2185_v55 = vpop.eup %2184  ;;  %v785_v18 = vmul.f32 %v2183_v57, %v689_v50  ;;  %v726_v21 = vadd.f32 1e-05, %v662_v51  ;;  %v596_v60 = vmul.f32 0.015625, %v505_v20  ;;  %v859_v29 = vadd.f32 %v2910_v44, %v823_v48  ;;  %v2163_v48 = vld [vmem:[#allocation8 + $0x8] sm:$0xff]   ;;  %2027 = vmatprep.subr.bf16.mxu0 %v2162_v11 }
 0x200   :  { %v784_v32 = vmul.f32 %v2185_v55, %v688_v46  ;;  %2186 = vrsqrt.f32 %v727_v8  ;;  %v661_v23 = vsub.f32 %v597_v13, %v629_v61  ;;  %v858_v46 = vadd.f32 %v2910_v44, %v822_v2  ;;  %2028 = vmatpush3.bf16.msra.mxu0 %v2162_v11  ;;  %v2164_v61 = vld [vmem:[#allocation8 + $0x10] sm:$0xff]  }
 0x201   :  { %2188 = vrsqrt.f32 %v726_v21  ;;  %v660_v26 = vsub.f32 %v596_v60, %v628_v62  ;;  %v423_v28 = vpop.xlane.xlu1 %422  ;;  %v821_v56 = vmul.f32 %v2905_v42, %v785_v18  ;;  %2029 = vmatprep.subr.bf16.mxu0 %v2163_v48  ;;  %v695_v62 = vsub.f32 %v2717_v9, %v2890_v3 }
 0x202   :  { %v725_v39 = vadd.f32 1e-05, %v661_v23  ;;  %v421_v40 = vpop.xlane.xlu0 %420  ;;  %v820_v43 = vmul.f32 %v2905_v42, %v784_v32  ;;  %2190 = vtanh.f32 %v859_v29  ;;  %v2926_v51 = vmul.f32 0.015625, %v423_v28  ;;  %v2165_v23 = vld [vmem:[#allocation8 + $0x18] sm:$0xff]  }
 0x203   :  { %v724_v58 = vadd.f32 1e-05, %v660_v26  ;;  %v857_v5 = vadd.f32 %v2910_v44, %v821_v56  ;;  %v2928_v57 = vmul.f32 0.015625, %v421_v40  ;;  %v694_v55 = vsub.f32 %v2720_v12, %v2893_v17 }
 0x204   :  { %2192 = vrsqrt.f32 %v725_v39  ;;  %v856_v63 = vadd.f32 %v2910_v44, %v820_v43  ;;  %v635_v18 = vmul.f32 %v2926_v51, %v2926_v51  ;;  %2030 = vmatpush3.bf16.msra.mxu0 %v2163_v48  ;;  %v693_v12 = vsub.f32 %v2725_v15, %v2900_v34 }
 0x205   :  { %2194 = vrsqrt.f32 %v724_v58  ;;  %v419_v50 = vpop.xlane.xlu1 %418  ;;  %v634_v9 = vmul.f32 %v2928_v57, %v2928_v57  ;;  %2031 = vmatprep.subr.bf16.mxu0 %v2164_v61  ;;  %v692_v17 = vsub.f32 %v2728_v16, %v2902_v37 }
 0x206   :  { %v417_v52 = vpop.xlane.xlu0 %416  ;;  %2196 = vtanh.f32 %v856_v63  ;;  %v2932_v8 = vmul.f32 0.015625, %v419_v50 }
 0x207   :  { %2198 = vtanh.f32 %v857_v5  ;;  %v2938_v21 = vmul.f32 0.015625, %v417_v52  ;;  %v2166_v52 = vld [vmem:[#allocation8 + $0x20] sm:$0xff]  }
 0x208   :  { %2200 = vtanh.f32 %v858_v46  ;;  %v633_v39 = vmul.f32 %v2932_v8, %v2932_v8  ;;  %2032 = vmatpush3.bf16.msra.mxu0 %v2164_v61 }
 0x209   :  { %v519_v13 = vpop.xlane.xlu1 %518  ;;  %v632_v11 = vmul.f32 %v2938_v21, %v2938_v21  ;;  %2033 = vmatprep.subr.bf16.mxu0 %v2165_v23 }
 0x20a   :  { %v2187_v20 = vpop.eup %2186  ;;  %v603_v60 = vmul.f32 0.015625, %v519_v13  ;;  %v517_v29 = vpop.xlane.xlu0 %516 }
 0x20b   :  { %v2189_v2 = vpop.eup %2188  ;;  %v791_v32 = vmul.f32 %v2187_v20, %v695_v62  ;;  %v602_v3 = vmul.f32 0.015625, %v517_v29 }
 0x20c   :  { %v790_v26 = vmul.f32 %v2189_v2, %v694_v55  ;;  %v667_v28 = vsub.f32 %v603_v60, %v635_v18  ;;  %v2191_v56 = vpop.eup %2190  ;;  %2034 = vmatpush3.bf16.msra.mxu0 %v2165_v23 }
 0x20d   :  { %v666_v40 = vsub.f32 %v602_v3, %v634_v9  ;;  %v515_v43 = vpop.xlane.xlu1 %514  ;;  %v827_v15 = vmul.f32 %v2905_v42, %v791_v32  ;;  %2035 = vmatprep.subr.bf16.mxu0 %v2166_v52 }
 0x20e   :  { %v2193_v58 = vpop.eup %2192  ;;  %v826_v5 = vmul.f32 %v2905_v42, %v790_v26  ;;  %v731_v48 = vadd.f32 1e-05, %v667_v28  ;;  %v601_v63 = vmul.f32 0.015625, %v515_v43  ;;  %v513_v46 = vpop.xlane.xlu0 %512 }
 0x20f   :  { %v2195_v50 = vpop.eup %2194  ;;  %v789_v34 = vmul.f32 %v2193_v58, %v693_v12  ;;  %v730_v16 = vadd.f32 1e-05, %v666_v40  ;;  %v600_v37 = vmul.f32 0.015625, %v513_v46  ;;  %v863_v43 = vadd.f32 %v2910_v44, %v827_v15 }
 0x210   :  { %v2197_v62 = vpop.eup %2196  ;;  %v788_v13 = vmul.f32 %v2195_v50, %v692_v17  ;;  %2202 = vrsqrt.f32 %v731_v48  ;;  %v665_v20 = vsub.f32 %v601_v63, %v633_v39  ;;  %v862_v55 = vadd.f32 %v2910_v44, %v826_v5  ;;  %v2167_v39 = vld [vmem:[#allocation8 + $0x28] sm:$0xff]   ;;  %2036 = vmatpush3.bf16.msra.mxu0 %v2166_v52 }
 0x211   :  { %v2199_v18 = vpop.eup %2198  ;;  %v825_v60 = vmul.f32 %v2905_v42, %v789_v34  ;;  %2204 = vrsqrt.f32 %v730_v16  ;;  %v664_v29 = vsub.f32 %v600_v37, %v632_v11  ;;  %v431_v61 = vpop.xlane.xlu1 %430  ;;  %2037 = vmatprep.subr.bf16.mxu0 %v2167_v39  ;;  %v698_v63 = vsub.f32 %v2751_v30, %v2928_v57 }
 0x212   :  { %v2201_v2 = vpop.eup %2200  ;;  %v824_v32 = vmul.f32 %v2905_v42, %v788_v13  ;;  %v729_v9 = vadd.f32 1e-05, %v665_v20  ;;  %v429_v3 = vpop.xlane.xlu0 %428  ;;  %v920_v26 = vpack.c.bf16 %v2199_v18, %v2197_v62  ;;  %2206 = vtanh.f32 %v862_v55 }
 0x213   :  { %v728_v28 = vadd.f32 1e-05, %v664_v29  ;;  %v921_v12 = vpack.c.bf16 %v2191_v56, %v2201_v2  ;;  %v861_v17 = vadd.f32 %v2910_v44, %v825_v60  ;;  %v2958_v5 = vmul.f32 0.015625, %v431_v61 }
 0x214   :  { %2208 = vrsqrt.f32 %v729_v9  ;;  %1995 = vmatprep.mubr.bf16.mxu1 %v920_v26  ;;  %v860_v40 = vadd.f32 %v2910_v44, %v824_v32  ;;  %v2960_v23 = vmul.f32 0.015625, %v429_v3  ;;  %2038 = vmatpush3.bf16.msra.mxu0 %v2167_v39  ;;  %v699_v37 = vsub.f32 %v2745_v25, %v2926_v51 }
 0x215   :  { %2210 = vrsqrt.f32 %v728_v28  ;;  %1996 = vmatmul.mubr.bf16.vlgmr.msra.gmra.mrb[0].mxu1 %v921_v12  ;;  %v427_v58 = vpop.xlane.xlu1 %426  ;;  %v639_v46 = vmul.f32 %v2958_v5, %v2958_v5  ;;  %v697_v55 = vsub.f32 %v2765_v36, %v2932_v8  ;;  %v696_v2 = vsub.f32 %v2768_v38, %v2938_v21 }
 0x216   :  { %v425_v11 = vpop.xlane.xlu0 %424  ;;  %2212 = vtanh.f32 %v860_v40  ;;  %v2966_v50 = vmul.f32 0.015625, %v427_v58  ;;  %v638_v52 = vmul.f32 %v2960_v23, %v2960_v23 }
 0x217   :  { %2214 = vtanh.f32 %v861_v17  ;;  %v2972_v62 = vmul.f32 0.015625, %v425_v11 }
 0x218   :  { %2216 = vtanh.f32 %v863_v43  ;;  %v637_v25 = vmul.f32 %v2966_v50, %v2966_v50 }
 0x219   :  { %v527_v56 = vpop.xlane.xlu1 %526  ;;  %v636_v28 = vmul.f32 %v2972_v62, %v2972_v62 }
 0x21a   :  { %v2203_v48 = vpop.eup %2202  ;;  %v607_v15 = vmul.f32 0.015625, %v527_v56  ;;  %v525_v34 = vpop.xlane.xlu0 %524 }
 0x21b   :  { %v2205_v16 = vpop.eup %2204  ;;  %v606_v13 = vmul.f32 0.015625, %v525_v34  ;;  %v795_v18 = vmul.f32 %v2203_v48, %v699_v37 }
 0x21c   :  { %v794_v20 = vmul.f32 %v2205_v16, %v698_v63  ;;  %v671_v30 = vsub.f32 %v607_v15, %v639_v46  ;;  %v2207_v57 = vpop.eup %2206 }
 0x21d   :  { %v670_v60 = vsub.f32 %v606_v13, %v638_v52  ;;  %v523_v29 = vpop.xlane.xlu1 %522  ;;  %v831_v21 = vmul.f32 %v2905_v42, %v795_v18 }
 0x21e   :  { %v2209_v61 = vpop.eup %2208  ;;  %v735_v51 = vadd.f32 1e-05, %v671_v30  ;;  %v605_v32 = vmul.f32 0.015625, %v523_v29  ;;  %v521_v9 = vpop.xlane.xlu0 %520  ;;  %v830_v17 = vmul.f32 %v2905_v42, %v794_v20 }
 0x21f   :  { %v2211_v3 = vpop.eup %2210  ;;  %v793_v26 = vmul.f32 %v2209_v61, %v697_v55  ;;  %v734_v12 = vadd.f32 1e-05, %v670_v60  ;;  %v604_v36 = vmul.f32 0.015625, %v521_v9  ;;  %v867_v30 = vadd.f32 %v2910_v44, %v831_v21 }
 0x220   :  { %v2213_v8 = vpop.eup %2212  ;;  %v792_v39 = vmul.f32 %v2211_v3, %v696_v2  ;;  %2218 = vrsqrt.f32 %v735_v51  ;;  %v669_v40 = vsub.f32 %v605_v32, %v637_v25  ;;  %v866_v13 = vadd.f32 %v2910_v44, %v830_v17 }
 0x221   :  { %v2215_v38 = vpop.eup %2214  ;;  %v829_v43 = vmul.f32 %v2905_v42, %v793_v26  ;;  %2220 = vrsqrt.f32 %v734_v12  ;;  %v668_v58 = vsub.f32 %v604_v36, %v636_v28  ;;  %v439_v11 = vpop.xlane.xlu1 %438  ;;  %v702_v25 = vsub.f32 %v2799_v0, %v2960_v23 }
 0x222   :  { %v2217_v56 = vpop.eup %2216  ;;  %v828_v48 = vmul.f32 %v2905_v42, %v792_v39  ;;  %v733_v63 = vadd.f32 1e-05, %v669_v40  ;;  %v437_v46 = vpop.xlane.xlu0 %436  ;;  %v922_v15 = vpack.c.bf16 %v2215_v38, %v2213_v8  ;;  %v2990_v55 = vmul.f32 0.015625, %v439_v11 }
 0x223   :  { %v732_v34 = vadd.f32 1e-05, %v668_v58  ;;  %v923_v16 = vpack.c.bf16 %v2217_v56, %v2207_v57  ;;  %v865_v37 = vadd.f32 %v2910_v44, %v829_v43  ;;  %v2992_v60 = vmul.f32 0.015625, %v437_v46 }
 0x224   :  { %2222 = vrsqrt.f32 %v733_v63  ;;  %1999 = vmatprep.mubr.bf16.mxu1 %v922_v15  ;;  %v864_v52 = vadd.f32 %v2910_v44, %v828_v48  ;;  %v703_v57 = vsub.f32 %v2793_v54, %v2958_v5  ;;  %v643_v51 = vmul.f32 %v2990_v55, %v2990_v55 }
 0x225   :  { %2224 = vrsqrt.f32 %v732_v34  ;;  %2000 = vmatmul.mubr.bf16.gmra.mrb[4].mxu1 %v923_v16  ;;  %v435_v20 = vpop.xlane.xlu1 %434  ;;  %v642_v54 = vmul.f32 %v2992_v60, %v2992_v60  ;;  %v701_v8 = vsub.f32 %v2814_v7, %v2966_v50  ;;  %v700_v0 = vsub.f32 %v2818_v10, %v2972_v62 }
 0x226   :  { %v433_v18 = vpop.xlane.xlu0 %432  ;;  %2226 = vtanh.f32 %v864_v52  ;;  %v2996_v29 = vmul.f32 0.015625, %v435_v20 }
 0x227   :  { %2228 = vtanh.f32 %v865_v37  ;;  %v3002_v32 = vmul.f32 0.015625, %v433_v18 }
 0x228   :  { %2230 = vtanh.f32 %v866_v13  ;;  %v641_v23 = vmul.f32 %v2996_v29, %v2996_v29 }
 0x229   :  { %v535_v61 = vpop.xlane.xlu1 %534  ;;  %2232 = vtanh.f32 %v867_v30  ;;  %v640_v21 = vmul.f32 %v3002_v32, %v3002_v32 }
 0x22a   :  { %v2219_v2 = vpop.eup %2218  ;;  %v611_v9 = vmul.f32 0.015625, %v535_v61  ;;  %v533_v3 = vpop.xlane.xlu0 %532 }
 0x22b   :  { %v2221_v26 = vpop.eup %2220  ;;  %v799_v28 = vmul.f32 %v2219_v2, %v703_v57  ;;  %v610_v5 = vmul.f32 0.015625, %v533_v3 }
 0x22c   :  { %v798_v12 = vmul.f32 %v2221_v26, %v702_v25  ;;  %v675_v36 = vsub.f32 %v611_v9, %v643_v51 }
 0x22d   :  { %v674_v17 = vsub.f32 %v610_v5, %v642_v54  ;;  %v531_v39 = vpop.xlane.xlu1 %530  ;;  %v835_v7 = vmul.f32 %v2905_v42, %v799_v28 }
 0x22e   :  { %v2223_v40 = vpop.eup %2222  ;;  %v834_v38 = vmul.f32 %v2905_v42, %v798_v12  ;;  %v739_v43 = vadd.f32 1e-05, %v675_v36  ;;  %v609_v58 = vmul.f32 0.015625, %v531_v39  ;;  %v529_v11 = vpop.xlane.xlu0 %528 }
 0x22f   :  { %v2225_v56 = vpop.eup %2224  ;;  %v797_v50 = vmul.f32 %v2223_v40, %v701_v8  ;;  %v738_v48 = vadd.f32 1e-05, %v674_v17  ;;  %v608_v10 = vmul.f32 0.015625, %v529_v11  ;;  %v871_v9 = vadd.f32 %v2910_v44, %v835_v7 }
 0x230   :  { %v2227_v62 = vpop.eup %2226  ;;  %v796_v63 = vmul.f32 %v2225_v56, %v700_v0  ;;  %2234 = vrsqrt.f32 %v739_v43  ;;  %v673_v46 = vsub.f32 %v609_v58, %v641_v23  ;;  %v870_v15 = vadd.f32 %v2910_v44, %v834_v38 }
 0x231   :  { %v2229_v34 = vpop.eup %2228  ;;  %v833_v16 = vmul.f32 %v2905_v42, %v797_v50  ;;  %2236 = vrsqrt.f32 %v738_v48  ;;  %v672_v37 = vsub.f32 %v608_v10, %v640_v21  ;;  %v447_v52 = vpop.xlane.xlu1 %446  ;;  %v706_v8 = vsub.f32 %v2748_v27, %v2992_v60 }
 0x232   :  { %v2231_v13 = vpop.eup %2230  ;;  %v832_v20 = vmul.f32 %v2905_v42, %v796_v63  ;;  %v737_v30 = vadd.f32 1e-05, %v673_v46  ;;  %v445_v18 = vpop.xlane.xlu0 %444  ;;  %v924_v57 = vpack.c.bf16 %v2229_v34, %v2227_v62  ;;  %2238 = vtanh.f32 %v870_v15 }
 0x233   :  { %v2233_v61 = vpop.eup %2232  ;;  %v736_v2 = vadd.f32 1e-05, %v672_v37  ;;  %v869_v25 = vadd.f32 %v2910_v44, %v833_v16  ;;  %v3022_v28 = vmul.f32 0.015625, %v447_v52  ;;  %v3024_v5 = vmul.f32 0.015625, %v445_v18 }
 0x234   :  { %2240 = vrsqrt.f32 %v737_v30  ;;  %2003 = vmatprep.mubr.bf16.mxu1 %v924_v57  ;;  %v925_v51 = vpack.c.bf16 %v2233_v61, %v2231_v13  ;;  %v868_v26 = vadd.f32 %v2910_v44, %v832_v20  ;;  %v707_v38 = vsub.f32 %v2758_v33, %v2990_v55 }
 0x235   :  { %2242 = vrsqrt.f32 %v736_v2  ;;  %v443_v3 = vpop.xlane.xlu1 %442  ;;  %v647_v0 = vmul.f32 %v3022_v28, %v3022_v28  ;;  %v646_v21 = vmul.f32 %v3024_v5, %v3024_v5  ;;  %v705_v60 = vsub.f32 %v2762_v35, %v2996_v29 }
 0x236   :  { %2004 = vmatmul.mubr.bf16.gmra.mrb[8].mxu1 %v925_v51  ;;  %v441_v54 = vpop.xlane.xlu0 %440  ;;  %2244 = vtanh.f32 %v869_v25  ;;  %v3030_v23 = vmul.f32 0.015625, %v443_v3  ;;  %v704_v62 = vsub.f32 %v2754_v31, %v3002_v32 }
 0x237   :  { %2246 = vtanh.f32 %v868_v26  ;;  %v3036_v43 = vmul.f32 0.015625, %v441_v54 }
 0x238   :  { %2248 = vtanh.f32 %v871_v9  ;;  %v645_v33 = vmul.f32 %v3030_v23, %v3030_v23 }
 0x239   :  { %v543_v12 = vpop.xlane.xlu1 %542  ;;  %v644_v16 = vmul.f32 %v3036_v43, %v3036_v43 }
 0x23a   :  { %v2235_v36 = vpop.eup %2234  ;;  %v615_v17 = vmul.f32 0.015625, %v543_v12  ;;  %v541_v39 = vpop.xlane.xlu0 %540 }
 0x23b   :  { %v2237_v40 = vpop.eup %2236  ;;  %v614_v58 = vmul.f32 0.015625, %v541_v39  ;;  %v803_v7 = vmul.f32 %v2235_v36, %v707_v38  ;;  %v711_v38 = vsub.f32 %v2783_v47, %v3022_v28 }
 0x23c   :  { %v802_v11 = vmul.f32 %v2237_v40, %v706_v8  ;;  %v679_v56 = vsub.f32 %v615_v17, %v647_v0  ;;  %v2239_v27 = vpop.eup %2238 }
 0x23d   :  { %v678_v50 = vsub.f32 %v614_v58, %v646_v21  ;;  %v539_v48 = vpop.xlane.xlu1 %538  ;;  %v839_v32 = vmul.f32 %v2905_v42, %v803_v7 }
 0x23e   :  { %v2241_v10 = vpop.eup %2240  ;;  %v743_v55 = vadd.f32 1e-05, %v679_v56  ;;  %v613_v63 = vmul.f32 0.015625, %v539_v48  ;;  %v537_v46 = vpop.xlane.xlu0 %536  ;;  %v838_v52 = vmul.f32 %v2905_v42, %v802_v11  ;;  %v710_v56 = vsub.f32 %v2775_v41, %v3024_v5 }
 0x23f   :  { %v2243_v15 = vpop.eup %2242  ;;  %v801_v34 = vmul.f32 %v2241_v10, %v705_v60  ;;  %v742_v37 = vadd.f32 1e-05, %v678_v50  ;;  %v612_v35 = vmul.f32 0.015625, %v537_v46  ;;  %v875_v0 = vadd.f32 %v2910_v44, %v839_v32 }
 0x240   :  { %v2245_v29 = vpop.eup %2244  ;;  %v800_v13 = vmul.f32 %v2243_v15, %v704_v62  ;;  %2250 = vrsqrt.f32 %v743_v55  ;;  %v677_v20 = vsub.f32 %v613_v63, %v645_v33  ;;  %v874_v36 = vadd.f32 %v2910_v44, %v838_v52 }
 0x241   :  { %v2247_v31 = vpop.eup %2246  ;;  %v837_v30 = vmul.f32 %v2905_v42, %v801_v34  ;;  %2252 = vrsqrt.f32 %v742_v37  ;;  %v676_v18 = vsub.f32 %v612_v35, %v644_v16  ;;  %v455_v57 = vpop.xlane.xlu1 %454  ;;  %v709_v55 = vsub.f32 %v2786_v49, %v3030_v23 }
 0x242   :  { %v2249_v61 = vpop.eup %2248  ;;  %v836_v2 = vmul.f32 %v2905_v42, %v800_v13  ;;  %v741_v25 = vadd.f32 1e-05, %v677_v20  ;;  %v453_v51 = vpop.xlane.xlu0 %452  ;;  %v926_v9 = vpack.c.bf16 %v2245_v29, %v2247_v31  ;;  %v3054_v17 = vmul.f32 0.015625, %v455_v57 }
 0x243   :  { %v740_v3 = vadd.f32 1e-05, %v676_v18  ;;  %v927_v26 = vpack.c.bf16 %v2249_v61, %v2239_v27  ;;  %v873_v54 = vadd.f32 %v2910_v44, %v837_v30  ;;  %v3056_v40 = vmul.f32 0.015625, %v453_v51 }
 0x244   :  { %2254 = vrsqrt.f32 %v741_v25  ;;  %2007 = vmatprep.mubr.bf16.mxu1 %v926_v9  ;;  %v872_v12 = vadd.f32 %v2910_v44, %v836_v2  ;;  %v651_v27 = vmul.f32 %v3054_v17, %v3054_v17  ;;  %v708_v41 = vsub.f32 %v2780_v45, %v3036_v43 }
 0x245   :  { %2256 = vrsqrt.f32 %v740_v3  ;;  %2008 = vmatmul.mubr.bf16.gmra.mrb[12].mxu1 %v927_v26  ;;  %v451_v8 = vpop.xlane.xlu1 %450  ;;  %v650_v47 = vmul.f32 %v3056_v40, %v3056_v40 }
 0x246   :  { %v449_v39 = vpop.xlane.xlu0 %448  ;;  %2258 = vtanh.f32 %v872_v12  ;;  %v3060_v21 = vmul.f32 0.015625, %v451_v8 }
 0x247   :  { %2260 = vtanh.f32 %v873_v54  ;;  %v3066_v60 = vmul.f32 0.015625, %v449_v39 }
 0x248   :  { %2262 = vtanh.f32 %v874_v36  ;;  %v649_v5 = vmul.f32 %v3060_v21, %v3060_v21 }
 0x249   :  { %v551_v58 = vpop.xlane.xlu1 %550  ;;  %2264 = vtanh.f32 %v875_v0  ;;  %v648_v16 = vmul.f32 %v3066_v60, %v3066_v60 }
 0x24a   :  { %v2251_v11 = vpop.eup %2250  ;;  %v619_v7 = vmul.f32 0.015625, %v551_v58  ;;  %v549_v50 = vpop.xlane.xlu0 %548 }
 0x24b   :  { %v2253_v48 = vpop.eup %2252  ;;  %v807_v10 = vmul.f32 %v2251_v11, %v711_v38  ;;  %v618_v28 = vmul.f32 0.015625, %v549_v50 }
 0x24c   :  { %v806_v62 = vmul.f32 %v2253_v48, %v710_v56  ;;  %v683_v33 = vsub.f32 %v619_v7, %v651_v27  ;;  %v715_v56 = vsub.f32 %v2806_v4, %v3054_v17  ;;  %v714_v48 = vsub.f32 %v2796_v59, %v3056_v40 }
 0x24d   :  { %v682_v63 = vsub.f32 %v618_v28, %v650_v47  ;;  %v547_v46 = vpop.xlane.xlu1 %546  ;;  %v843_v49 = vmul.f32 %v2905_v42, %v807_v10  ;;  %v713_v17 = vsub.f32 %v2810_v6, %v3060_v21  ;;  %v712_v59 = vsub.f32 %v2802_v1, %v3066_v60 }
 0x24e   :  { %v2255_v15 = vpop.eup %2254  ;;  %v842_v34 = vmul.f32 %v2905_v42, %v806_v62  ;;  %v747_v37 = vadd.f32 1e-05, %v683_v33  ;;  %v617_v35 = vmul.f32 0.015625, %v547_v46  ;;  %v545_v29 = vpop.xlane.xlu0 %544 }
 0x24f   :  { %v2257_v52 = vpop.eup %2256  ;;  %v805_v23 = vmul.f32 %v2255_v15, %v709_v55  ;;  %v746_v13 = vadd.f32 1e-05, %v682_v63  ;;  %v616_v45 = vmul.f32 0.015625, %v545_v29  ;;  %v879_v8 = vadd.f32 %v2910_v44, %v843_v49 }
 0x250   :  { %v2259_v43 = vpop.eup %2258  ;;  %v804_v20 = vmul.f32 %v2257_v52, %v708_v41  ;;  %2266 = vrsqrt.f32 %v747_v37  ;;  %v681_v31 = vsub.f32 %v617_v35, %v649_v5  ;;  %v878_v32 = vadd.f32 %v2910_v44, %v842_v34 }
 0x251   :  { %v2261_v30 = vpop.eup %2260  ;;  %v841_v18 = vmul.f32 %v2905_v42, %v805_v23  ;;  %2268 = vrsqrt.f32 %v746_v13  ;;  %v680_v57 = vsub.f32 %v616_v45, %v648_v16  ;;  %v463_v61 = vpop.xlane.xlu1 %462 }
 0x252   :  { %v2263_v2 = vpop.eup %2262  ;;  %v840_v25 = vmul.f32 %v2905_v42, %v804_v20  ;;  %v745_v51 = vadd.f32 1e-05, %v681_v31  ;;  %v461_v9 = vpop.xlane.xlu0 %460  ;;  %v928_v3 = vpack.c.bf16 %v2261_v30, %v2259_v43  ;;  %2270 = vtanh.f32 %v878_v32 }
 0x253   :  { %v2265_v26 = vpop.eup %2264  ;;  %v744_v54 = vadd.f32 1e-05, %v680_v57  ;;  %v877_v12 = vadd.f32 %v2910_v44, %v841_v18  ;;  %v3092_v27 = vmul.f32 0.015625, %v463_v61  ;;  %v3096_v10 = vmul.f32 0.015625, %v461_v9 }
 0x254   :  { %2272 = vrsqrt.f32 %v745_v51  ;;  %2011 = vmatprep.mubr.bf16.mxu1 %v928_v3  ;;  %v929_v36 = vpack.c.bf16 %v2265_v26, %v2263_v2  ;;  %v876_v39 = vadd.f32 %v2910_v44, %v840_v25 }
 0x255   :  { %2274 = vrsqrt.f32 %v744_v54  ;;  %v459_v0 = vpop.xlane.xlu1 %458  ;;  %v655_v15 = vmul.f32 %v3092_v27, %v3092_v27  ;;  %v654_v29 = vmul.f32 %v3096_v10, %v3096_v10 }
 0x256   :  { %2012 = vmatmul.mubr.bf16.gmra.mrb[16].mxu1 %v929_v36  ;;  %v3086_v38 = vmul.f32 0.015625, %v459_v0  ;;  %v457_v58 = vpop.xlane.xlu0 %456  ;;  %2276 = vtanh.f32 %v877_v12 }
 0x257   :  { %v3088_v11 = vmul.f32 0.015625, %v457_v58  ;;  %2278 = vtanh.f32 %v876_v39 }
 0x258   :  { %2280 = vtanh.f32 %v879_v8  ;;  %v653_v47 = vmul.f32 %v3086_v38, %v3086_v38  ;;  %v717_v54 = vsub.f32 %v2836_v24, %v3086_v38 }
 0x259   :  { %v555_v7 = vpop.xlane.xlu1 %554  ;;  %v652_v41 = vmul.f32 %v3088_v11, %v3088_v11  ;;  %v716_v36 = vsub.f32 %v2830_v19, %v3088_v11 }
 0x25a   :  { %v2267_v50 = vpop.eup %2266  ;;  %v621_v28 = vmul.f32 0.015625, %v555_v7  ;;  %v553_v62 = vpop.xlane.xlu0 %552  ;;  %v719_v7 = vsub.f32 %v2833_v22, %v3092_v27 }
 0x25b   :  { %v2269_v33 = vpop.eup %2268  ;;  %v811_v55 = vmul.f32 %v2267_v50, %v715_v56  ;;  %v620_v4 = vmul.f32 0.015625, %v553_v62 }
 0x25c   :  { %v810_v5 = vmul.f32 %v2269_v33, %v714_v48  ;;  %v685_v63 = vsub.f32 %v621_v28, %v653_v47  ;;  %v2271_v46 = vpop.eup %2270  ;;  %v718_v47 = vsub.f32 %v2825_v14, %v3096_v10 }
 0x25d   :  { %v847_v40 = vmul.f32 %v2905_v42, %v811_v55  ;;  %v684_v34 = vsub.f32 %v620_v4, %v652_v41  ;;  %v559_v16 = vpop.xlane.xlu1 %558  ;;  %v2168_v55 = vld [vmem:[#allocation8 + $0x30] sm:$0xff]   ;;  %v2169_v41 = vld [vmem:[#allocation8 + $0x38] sm:$0xff]  }
 0x25e   :  { %v2273_v37 = vpop.eup %2272  ;;  %v846_v35 = vmul.f32 %v2905_v42, %v810_v5  ;;  %v749_v6 = vadd.f32 1e-05, %v685_v63  ;;  %v623_v21 = vmul.f32 0.015625, %v559_v16  ;;  %v557_v52 = vpop.xlane.xlu0 %556  ;;  %2039 = vmatprep.subr.bf16.mxu0 %v2168_v55  ;;  %v2170_v16 = vld [vmem:[#allocation10] sm:$0xff]  }
 0x25f   :  { %v2275_v49 = vpop.eup %2274  ;;  %v809_v23 = vmul.f32 %v2273_v37, %v713_v17  ;;  %v748_v13 = vadd.f32 1e-05, %v684_v34  ;;  %v622_v1 = vmul.f32 0.015625, %v557_v52  ;;  %v883_v60 = vadd.f32 %v2910_v44, %v847_v40  ;;  %2040 = vmatpush3.bf16.msra.mxu0 %v2168_v55  ;;  %v2171_v37 = vld [vmem:[#allocation10 + $0x8] sm:$0xff]   ;;  %2123 = vmatprep.subr.bf16.mxu1 %v2170_v16 }
 0x260   :  { %v2277_v45 = vpop.eup %2276  ;;  %v808_v43 = vmul.f32 %v2275_v49, %v712_v59  ;;  %2282 = vrsqrt.f32 %v749_v6  ;;  %v687_v20 = vsub.f32 %v623_v21, %v655_v15  ;;  %v882_v31 = vadd.f32 %v2910_v44, %v846_v35  ;;  %2041 = vmatprep.subr.bf16.mxu0 %v2169_v41  ;;  %2131 = vmatpush3.bf16.msra.mxu1 %v2170_v16 }
 0x261   :  { %v2279_v32 = vpop.eup %2278  ;;  %v845_v30 = vmul.f32 %v2905_v42, %v809_v23  ;;  %2284 = vrsqrt.f32 %v748_v13  ;;  %v686_v18 = vsub.f32 %v622_v1, %v654_v29  ;;  %v954_v34 = vsub.s32 3, %v2684_v53  ;;  %2124 = vmatprep.subr.bf16.mxu1 %v2171_v37  ;;  %v2172_v29 = vld [vmem:[#allocation10 + $0x10] sm:$0xff]  }
 0x262   :  { %v2281_v57 = vpop.eup %2280  ;;  %v844_v61 = vmul.f32 %v2905_v42, %v808_v43  ;;  %v751_v2 = vadd.f32 1e-05, %v687_v20  ;;  %v930_v25 = vpack.c.bf16 %v2277_v45, %v2279_v32  ;;  %2286 = vtanh.f32 %v882_v31 }
 0x263   :  { %v750_v51 = vadd.f32 1e-05, %v686_v18  ;;  %v931_v9 = vpack.c.bf16 %v2281_v57, %v2271_v46  ;;  %v881_v3 = vadd.f32 %v2910_v44, %v845_v30  ;;  %2288 = vtanh.f32 %v883_v60  ;;  %2042 = vmatpush3.bf16.msra.mxu0 %v2169_v41  ;;  %v2173_v60 = vld [vmem:[#allocation10 + $0x18] sm:$0xff]   ;;  %v2174_v18 = vld [vmem:[#allocation10 + $0x20] sm:$0xff]  }
 0x264   :  { %2290 = vrsqrt.f32 %v751_v2  ;;  %2015 = vmatprep.mubr.bf16.mxu1 %v930_v25  ;;  %v880_v26 = vadd.f32 %v2910_v44, %v844_v61  ;;  %2075 = vmatprep.subr.bf16.mxu0 %v2170_v16  ;;  %v2175_v61 = vld [vmem:[#allocation10 + $0x28] sm:$0xff]  }
 0x265   :  { %2292 = vrsqrt.f32 %v750_v51  ;;  %2016 = vmatmul.mubr.bf16.gmra.mrb[20].mxu1 %v931_v9 }
 0x266   :  { %2294 = vtanh.f32 %v880_v26  ;;  %2132 = vmatpush3.bf16.msra.mxu1 %v2171_v37 }
 0x267   :  { %2296 = vtanh.f32 %v881_v3  ;;  %2125 = vmatprep.subr.bf16.mxu1 %v2172_v29 }
 0x26a   :  { %v2283_v12 = vpop.eup %2282  ;;  %2133 = vmatpush3.bf16.msra.mxu1 %v2172_v29 }
 0x26b   :  { %v2285_v8 = vpop.eup %2284  ;;  %v813_v0 = vmul.f32 %v2283_v12, %v717_v54  ;;  %2126 = vmatprep.subr.bf16.mxu1 %v2173_v60 }
 0x26c   :  { %v2287_v39 = vpop.eup %2286  ;;  %v812_v58 = vmul.f32 %v2285_v8, %v716_v36 }
 0x26d   :  { %v2289_v56 = vpop.eup %2288  ;;  %v849_v50 = vmul.f32 %v2905_v42, %v813_v0 }
 0x26e   :  { %v2291_v48 = vpop.eup %2290  ;;  %v848_v24 = vmul.f32 %v2905_v42, %v812_v58  ;;  %v933_v14 = vpack.c.bf16 %v2289_v56, %v2287_v39  ;;  %2134 = vmatpush3.bf16.msra.mxu1 %v2173_v60 }
 0x26f   :  { %v2293_v38 = vpop.eup %2292  ;;  %v815_v28 = vmul.f32 %v2291_v48, %v719_v7  ;;  %v885_v19 = vadd.f32 %v2910_v44, %v849_v50  ;;  %2127 = vmatprep.subr.bf16.mxu1 %v2174_v18 }
 0x270   :  { %v2295_v11 = vpop.eup %2294  ;;  %v814_v62 = vmul.f32 %v2293_v38, %v718_v47  ;;  %v884_v33 = vadd.f32 %v2910_v44, %v848_v24 }
 0x271   :  { %v2297_v4 = vpop.eup %2296  ;;  %v851_v22 = vmul.f32 %v2905_v42, %v815_v28  ;;  %2298 = vtanh.f32 %v885_v19 }
 0x272   :  { %v850_v27 = vmul.f32 %v2905_v42, %v814_v62  ;;  %v932_v17 = vpack.c.bf16 %v2297_v4, %v2295_v11  ;;  %2300 = vtanh.f32 %v884_v33  ;;  %2135 = vmatpush3.bf16.msra.mxu1 %v2174_v18 }
 0x273   :  { %v887_v10 = vadd.f32 %v2910_v44, %v851_v22  ;;  %2128 = vmatprep.subr.bf16.mxu1 %v2175_v61 }
 0x274   :  { %2019 = vmatprep.mubr.bf16.mxu1 %v932_v17  ;;  %v886_v5 = vadd.f32 %v2910_v44, %v850_v27  ;;  %v3135_v44 = vld [vmem:[#allocation11] sm:$0x3f] }
 0x275   :  { %2020 = vmatmul.mubr.bf16.gmra.mrb[24].mxu1 %v933_v14  ;;  %2302 = vtanh.f32 %v887_v10  ;;  %v3138_v35 = vrot.slane %v3135_v44, %v954_v34 }
 0x276   :  { %2304 = vtanh.f32 %v886_v5  ;;  %2136 = vmatpush3.bf16.msra.mxu1 %v2175_v61 }
 0x27b   :  { %v2299_v63 = vpop.eup %2298 }
 0x27c   :  { %v2301_v46 = vpop.eup %2300 }
 0x27d   :  { %v934_v59 = vpack.c.bf16 %v2299_v63, %v2301_v46 }
 0x27f   :  { %v2303_v40 = vpop.eup %2302  ;;  %2023 = vmatprep.mubr.bf16.mxu1 %v934_v59 }
 0x280   :  { %v2305_v42 = vpop.eup %2304 }
 0x281   :  { %v935_v15 = vpack.c.bf16 %v2303_v40, %v2305_v42 }
 0x283   :  { %2024 = vmatmul.mubr.bf16.gmra.mrb[28].mxu1 %v935_v15 }
 0x2e8   :  { %v1997_v6 = vpop.f32.mrb[0].mxu1 }
 0x2e9   :  { %v1047_v21 = vadd.f32 %v1997_v6, %v3138_v35  ;;  %v1038_v52 = vpop.f32.mrb[1].mxu1 }
 0x2ea   :  { %v1039_v49 = vadd.f32 %v1038_v52, %v3138_v35  ;;  %v1998_v23 = vpop.f32.mrb[2].mxu1 }
 0x2eb   :  { %v1050_v13 = vadd.f32 %v1998_v23, %v3138_v35  ;;  %v1041_v1 = vpop.f32.mrb[3].mxu1  ;;  %v1167_v43 = vmax.f32 %v1047_v21, 0.0 }
 0x2ec   :  { %v1042_v45 = vadd.f32 %v1041_v1, %v3138_v35  ;;  %v1165_v31 = vmax.f32 %v1039_v49, 0.0 }
 0x2ed   :  { %v1168_v20 = vmax.f32 %v1050_v13, 0.0 }
 0x2ee   :  { %v1166_v32 = vmax.f32 %v1042_v45, 0.0 }
 0x2ef   :  { %v1198_v30 = vpack.c.bf16 %v1168_v20, %v1167_v43 }
 0x2f0   :  { %v1197_v57 = vpack.c.bf16 %v1166_v32, %v1165_v31 }
 0x2f2   :  { %2043 = vmatprep.mubr.bf16.mxu0 %v1197_v57 }
 0x2f3   :  { %2044 = vmatmul.mubr.bf16.vlgmr.msra.gmra.mrb[32].mxu0 %v1198_v30 }
 0x2f4   :  { %2076 = vmatpush3.bf16.msra.mxu0 %v2170_v16 }
 0x2f5   :  { %2077 = vmatprep.subr.bf16.mxu0 %v2171_v37 }
 0x2f8   :  { %v2001_v2 = vpop.f32.mrb[4].mxu1  ;;  %2078 = vmatpush3.bf16.msra.mxu0 %v2171_v37 }
 0x2f9   :  { %v1063_v25 = vadd.f32 %v2001_v2, %v3138_v35  ;;  %v1054_v51 = vpop.f32.mrb[5].mxu1  ;;  %2079 = vmatprep.subr.bf16.mxu0 %v2172_v29 }
 0x2fa   :  { %v1055_v9 = vadd.f32 %v1054_v51, %v3138_v35  ;;  %v2002_v3 = vpop.f32.mrb[6].mxu1 }
 0x2fb   :  { %v1066_v26 = vadd.f32 %v2002_v3, %v3138_v35  ;;  %v1057_v54 = vpop.f32.mrb[7].mxu1  ;;  %v1171_v36 = vmax.f32 %v1063_v25, 0.0 }
 0x2fc   :  { %v1058_v12 = vadd.f32 %v1057_v54, %v3138_v35  ;;  %2080 = vmatpush3.bf16.msra.mxu0 %v2172_v29  ;;  %v1169_v0 = vmax.f32 %v1055_v9, 0.0 }
 0x2fd   :  { %v1172_v8 = vmax.f32 %v1066_v26, 0.0  ;;  %2081 = vmatprep.subr.bf16.mxu0 %v2173_v60 }
 0x2fe   :  { %v1170_v39 = vmax.f32 %v1058_v12, 0.0 }
 0x2ff   :  { %v1200_v58 = vpack.c.bf16 %v1172_v8, %v1171_v36 }
 0x300   :  { %v1199_v56 = vpack.c.bf16 %v1170_v39, %v1169_v0  ;;  %2082 = vmatpush3.bf16.msra.mxu0 %v2173_v60 }
 0x301   :  { %2083 = vmatprep.subr.bf16.mxu0 %v2174_v18 }
 0x302   :  { %2047 = vmatprep.mubr.bf16.mxu0 %v1199_v56 }
 0x303   :  { %2048 = vmatmul.mubr.bf16.gmra.mrb[36].mxu0 %v1200_v58 }
 0x304   :  { %2084 = vmatpush3.bf16.msra.mxu0 %v2174_v18 }
 0x305   :  { %2085 = vmatprep.subr.bf16.mxu0 %v2175_v61 }
 0x308   :  { %2086 = vmatpush3.bf16.msra.mxu0 %v2175_v61 }
 0x309   :  { %v2005_v7 = vpop.f32.mrb[8].mxu1 }
 0x30a   :  { %v1079_v50 = vadd.f32 %v2005_v7, %v3138_v35  ;;  %v1070_v48 = vpop.f32.mrb[9].mxu1 }
 0x30b   :  { %v1071_v47 = vadd.f32 %v1070_v48, %v3138_v35  ;;  %v2006_v24 = vpop.f32.mrb[10].mxu1 }
 0x30c   :  { %v1082_v38 = vadd.f32 %v2006_v24, %v3138_v35  ;;  %v1073_v28 = vpop.f32.mrb[11].mxu1  ;;  %v1175_v11 = vmax.f32 %v1079_v50, 0.0 }
 0x30d   :  { %v1074_v19 = vadd.f32 %v1073_v28, %v3138_v35  ;;  %v1173_v33 = vmax.f32 %v1071_v47, 0.0 }
 0x30e   :  { %v1176_v62 = vmax.f32 %v1082_v38, 0.0 }
 0x30f   :  { %v1174_v55 = vmax.f32 %v1074_v19, 0.0  ;;  %v2176_v19 = vld [vmem:[#allocation10 + $0x30] sm:$0xff]  }
 0x310   :  { %v1202_v41 = vpack.c.bf16 %v1176_v62, %v1175_v11  ;;  %v2177_v11 = vld [vmem:[#allocation10 + $0x38] sm:$0xff]   ;;  %2087 = vmatprep.subr.bf16.mxu0 %v2176_v19  ;;  %2129 = vmatprep.subr.bf16.mxu1 %v2176_v19 }
 0x311   :  { %v1201_v4 = vpack.c.bf16 %v1174_v55, %v1173_v33  ;;  %2088 = vmatpush3.bf16.msra.mxu0 %v2176_v19  ;;  %2137 = vmatpush3.bf16.msra.mxu1 %v2176_v19 }
 0x312   :  { %2089 = vmatprep.subr.bf16.mxu0 %v2177_v11  ;;  %2130 = vmatprep.subr.bf16.mxu1 %v2177_v11 }
 0x313   :  { %2051 = vmatprep.mubr.bf16.mxu0 %v1201_v4 }
 0x314   :  { %2052 = vmatmul.mubr.bf16.gmra.mrb[40].mxu0 %v1202_v41 }
 0x315   :  { %2090 = vmatpush3.bf16.msra.mxu0 %v2177_v11  ;;  %2138 = vmatpush3.bf16.msra.mxu1 %v2177_v11 }
 0x318   :  { %v2009_v22 = vpop.f32.mrb[12].mxu1 }
 0x319   :  { %v1095_v27 = vadd.f32 %v2009_v22, %v3138_v35  ;;  %v1086_v17 = vpop.f32.mrb[13].mxu1 }
 0x31a   :  { %v1087_v14 = vadd.f32 %v1086_v17, %v3138_v35  ;;  %v2010_v10 = vpop.f32.mrb[14].mxu1 }
 0x31b   :  { %v1098_v5 = vadd.f32 %v2010_v10, %v3138_v35  ;;  %v1089_v63 = vpop.f32.mrb[15].mxu1  ;;  %v1179_v59 = vmax.f32 %v1095_v27, 0.0 }
 0x31c   :  { %v1090_v46 = vadd.f32 %v1089_v63, %v3138_v35  ;;  %v1177_v42 = vmax.f32 %v1087_v14, 0.0 }
 0x31d   :  { %v1180_v40 = vmax.f32 %v1098_v5, 0.0 }
 0x31e   :  { %v1178_v15 = vmax.f32 %v1090_v46, 0.0 }
 0x31f   :  { %v1204_v34 = vpack.c.bf16 %v1180_v40, %v1179_v59 }
 0x320   :  { %v1203_v16 = vpack.c.bf16 %v1178_v15, %v1177_v42  ;;  %v1231_v15 = vsub.s32 4, %v2684_v53 }
 0x322   :  { %2055 = vmatprep.mubr.bf16.mxu0 %v1203_v16 }
 0x323   :  { %2056 = vmatmul.mubr.bf16.gmra.mrb[44].mxu0 %v1204_v34  ;;  %v3174_v34 = vrot.slane %v3135_v44, %v1231_v15 }
 0x329   :  { %v2013_v37 = vpop.f32.mrb[16].mxu1 }
 0x32a   :  { %v1111_v29 = vadd.f32 %v2013_v37, %v3138_v35  ;;  %v1102_v6 = vpop.f32.mrb[17].mxu1 }
 0x32b   :  { %v1103_v21 = vadd.f32 %v1102_v6, %v3138_v35  ;;  %v2014_v52 = vpop.f32.mrb[18].mxu1 }
 0x32c   :  { %v1114_v49 = vadd.f32 %v2014_v52, %v3138_v35  ;;  %v1105_v23 = vpop.f32.mrb[19].mxu1  ;;  %v1183_v1 = vmax.f32 %v1111_v29, 0.0 }
 0x32d   :  { %v1106_v13 = vadd.f32 %v1105_v23, %v3138_v35  ;;  %v1181_v45 = vmax.f32 %v1103_v21, 0.0 }
 0x32e   :  { %v1184_v60 = vmax.f32 %v1114_v49, 0.0 }
 0x32f   :  { %v1182_v43 = vmax.f32 %v1106_v13, 0.0 }
 0x330   :  { %v1206_v20 = vpack.c.bf16 %v1184_v60, %v1183_v1 }
 0x331   :  { %v1205_v31 = vpack.c.bf16 %v1182_v43, %v1181_v45 }
 0x333   :  { %2059 = vmatprep.mubr.bf16.mxu0 %v1205_v31 }
 0x334   :  { %2060 = vmatmul.mubr.bf16.gmra.mrb[48].mxu0 %v1206_v20 }
 0x338   :  { %v2017_v32 = vpop.f32.mrb[20].mxu1 }
 0x339   :  { %v1127_v30 = vadd.f32 %v2017_v32, %v3138_v35  ;;  %v1118_v18 = vpop.f32.mrb[21].mxu1 }
 0x33a   :  { %v1119_v57 = vadd.f32 %v1118_v18, %v3138_v35  ;;  %v2018_v61 = vpop.f32.mrb[22].mxu1 }
 0x33b   :  { %v1130_v2 = vadd.f32 %v2018_v61, %v3138_v35  ;;  %v1121_v25 = vpop.f32.mrb[23].mxu1  ;;  %v1187_v9 = vmax.f32 %v1127_v30, 0.0 }
 0x33c   :  { %v1122_v51 = vadd.f32 %v1121_v25, %v3138_v35  ;;  %v1185_v26 = vmax.f32 %v1119_v57, 0.0 }
 0x33d   :  { %v1188_v3 = vmax.f32 %v1130_v2, 0.0 }
 0x33e   :  { %v1186_v54 = vmax.f32 %v1122_v51, 0.0 }
 0x33f   :  { %v1208_v12 = vpack.c.bf16 %v1188_v3, %v1187_v9 }
 0x340   :  { %v1207_v36 = vpack.c.bf16 %v1186_v54, %v1185_v26 }
 0x342   :  { %2063 = vmatprep.mubr.bf16.mxu0 %v1207_v36 }
 0x343   :  { %2064 = vmatmul.mubr.bf16.gmra.mrb[52].mxu0 %v1208_v12 }
 0x348   :  { %v2021_v8 = vpop.f32.mrb[24].mxu1 }
 0x349   :  { %v1143_v0 = vadd.f32 %v2021_v8, %v3138_v35  ;;  %v1134_v39 = vpop.f32.mrb[25].mxu1 }
 0x34a   :  { %v1135_v58 = vadd.f32 %v1134_v39, %v3138_v35  ;;  %v2022_v56 = vpop.f32.mrb[26].mxu1 }
 0x34b   :  { %v1146_v7 = vadd.f32 %v2022_v56, %v3138_v35  ;;  %v1137_v50 = vpop.f32.mrb[27].mxu1  ;;  %v1191_v47 = vmax.f32 %v1143_v0, 0.0 }
 0x34c   :  { %v1138_v48 = vadd.f32 %v1137_v50, %v3138_v35  ;;  %v1189_v38 = vmax.f32 %v1135_v58, 0.0 }
 0x34d   :  { %v1192_v24 = vmax.f32 %v1146_v7, 0.0 }
 0x34e   :  { %v1190_v28 = vmax.f32 %v1138_v48, 0.0 }
 0x34f   :  { %v1210_v62 = vpack.c.bf16 %v1192_v24, %v1191_v47 }
 0x350   :  { %v1209_v33 = vpack.c.bf16 %v1190_v28, %v1189_v38 }
 0x352   :  { %2067 = vmatprep.mubr.bf16.mxu0 %v1209_v33 }
 0x353   :  { %2068 = vmatmul.mubr.bf16.gmra.mrb[56].mxu0 %v1210_v62 }
 0x356   :  { %v2025_v55 = vpop.f32.mrb[28].mxu1 }
 0x357   :  { %v1159_v41 = vadd.f32 %v2025_v55, %v3138_v35  ;;  %v1150_v4 = vpop.f32.mrb[29].mxu1 }
 0x358   :  { %v1151_v22 = vadd.f32 %v1150_v4, %v3138_v35  ;;  %v2026_v27 = vpop.f32.mrb[30].mxu1 }
 0x359   :  { %v1162_v17 = vadd.f32 %v2026_v27, %v3138_v35  ;;  %v1153_v14 = vpop.f32.mrb[31].mxu1  ;;  %v1195_v5 = vmax.f32 %v1159_v41, 0.0 }
 0x35a   :  { %v1154_v10 = vadd.f32 %v1153_v14, %v3138_v35  ;;  %v1193_v46 = vmax.f32 %v1151_v22, 0.0 }
 0x35b   :  { %v1196_v63 = vmax.f32 %v1162_v17, 0.0 }
 0x35c   :  { %v1194_v59 = vmax.f32 %v1154_v10, 0.0 }
 0x35d   :  { %v1212_v40 = vpack.c.bf16 %v1196_v63, %v1195_v5 }
 0x35e   :  { %v1211_v42 = vpack.c.bf16 %v1194_v59, %v1193_v46 }
 0x360   :  { %2071 = vmatprep.mubr.bf16.mxu0 %v1211_v42 }
 0x361   :  { %2072 = vmatmul.mubr.bf16.gmra.mrb[60].mxu0 %v1212_v40 }
 0x3c6   :  { %v2045_v16 = vpop.f32.mrb[32].mxu0 }
 0x3c7   :  { %v1324_v37 = vadd.f32 %v2045_v16, %v3174_v34  ;;  %v1315_v29 = vpop.f32.mrb[33].mxu0 }
 0x3c8   :  { %v1316_v6 = vadd.f32 %v1315_v29, %v3174_v34  ;;  %v2046_v35 = vpop.f32.mrb[34].mxu0 }
 0x3c9   :  { %v1327_v21 = vadd.f32 %v2046_v35, %v3174_v34  ;;  %v1318_v52 = vpop.f32.mrb[35].mxu0  ;;  %v1444_v23 = vmax.f32 %v1324_v37, 0.0 }
 0x3ca   :  { %v1319_v49 = vadd.f32 %v1318_v52, %v3174_v34  ;;  %v1442_v1 = vmax.f32 %v1316_v6, 0.0 }
 0x3cb   :  { %v1445_v13 = vmax.f32 %v1327_v21, 0.0 }
 0x3cc   :  { %v1443_v60 = vmax.f32 %v1319_v49, 0.0 }
 0x3cd   :  { %v1475_v45 = vpack.c.bf16 %v1445_v13, %v1444_v23 }
 0x3ce   :  { %v1474_v43 = vpack.c.bf16 %v1443_v60, %v1442_v1 }
 0x3d0   :  { %2091 = vmatprep.mubr.bf16.mxu0 %v1474_v43 }
 0x3d1   :  { %2092 = vmatmul.mubr.bf16.vlgmr.msra.gmra.mrb[64].mxu0 %v1475_v45 }
 0x3d6   :  { %v2049_v20 = vpop.f32.mrb[36].mxu0 }
 0x3d7   :  { %v1340_v31 = vadd.f32 %v2049_v20, %v3174_v34  ;;  %v1331_v32 = vpop.f32.mrb[37].mxu0 }
 0x3d8   :  { %v1332_v30 = vadd.f32 %v1331_v32, %v3174_v34  ;;  %v2050_v18 = vpop.f32.mrb[38].mxu0 }
 0x3d9   :  { %v1343_v57 = vadd.f32 %v2050_v18, %v3174_v34  ;;  %v1334_v61 = vpop.f32.mrb[39].mxu0  ;;  %v1448_v25 = vmax.f32 %v1340_v31, 0.0 }
 0x3da   :  { %v1335_v2 = vadd.f32 %v1334_v61, %v3174_v34  ;;  %v1446_v9 = vmax.f32 %v1332_v30, 0.0 }
 0x3db   :  { %v1449_v51 = vmax.f32 %v1343_v57, 0.0 }
 0x3dc   :  { %v1447_v3 = vmax.f32 %v1335_v2, 0.0 }
 0x3dd   :  { %v1477_v26 = vpack.c.bf16 %v1449_v51, %v1448_v25 }
 0x3de   :  { %v1476_v54 = vpack.c.bf16 %v1447_v3, %v1446_v9 }
 0x3e0   :  { %2095 = vmatprep.mubr.bf16.mxu1 %v1476_v54 }
 0x3e1   :  { %2096 = vmatmul.mubr.bf16.vlgmr.msra.gmra.mrb[32].mxu1 %v1477_v26 }
 0x3e7   :  { %v2053_v12 = vpop.f32.mrb[40].mxu0 }
 0x3e8   :  { %v1356_v36 = vadd.f32 %v2053_v12, %v3174_v34  ;;  %v1347_v8 = vpop.f32.mrb[41].mxu0 }
 0x3e9   :  { %v1348_v0 = vadd.f32 %v1347_v8, %v3174_v34  ;;  %v2054_v39 = vpop.f32.mrb[42].mxu0 }
 0x3ea   :  { %v1359_v58 = vadd.f32 %v2054_v39, %v3174_v34  ;;  %v1350_v56 = vpop.f32.mrb[43].mxu0  ;;  %v1452_v50 = vmax.f32 %v1356_v36, 0.0 }
 0x3eb   :  { %v1351_v7 = vadd.f32 %v1350_v56, %v3174_v34  ;;  %v1450_v47 = vmax.f32 %v1348_v0, 0.0 }
 0x3ec   :  { %v1453_v48 = vmax.f32 %v1359_v58, 0.0 }
 0x3ed   :  { %v1451_v24 = vmax.f32 %v1351_v7, 0.0 }
 0x3ee   :  { %v1479_v38 = vpack.c.bf16 %v1453_v48, %v1452_v50 }
 0x3ef   :  { %v1478_v28 = vpack.c.bf16 %v1451_v24, %v1450_v47 }
 0x3f1   :  { %2099 = vmatprep.mubr.bf16.mxu1 %v1478_v28 }
 0x3f2   :  { %2100 = vmatmul.mubr.bf16.gmra.mrb[36].mxu1 %v1479_v38 }
 0x3f6   :  { %v2057_v19 = vpop.f32.mrb[44].mxu0 }
 0x3f7   :  { %v1372_v11 = vadd.f32 %v2057_v19, %v3174_v34  ;;  %v1363_v62 = vpop.f32.mrb[45].mxu0 }
 0x3f8   :  { %v1364_v33 = vadd.f32 %v1363_v62, %v3174_v34  ;;  %v2058_v55 = vpop.f32.mrb[46].mxu0 }
 0x3f9   :  { %v1375_v41 = vadd.f32 %v2058_v55, %v3174_v34  ;;  %v1366_v4 = vpop.f32.mrb[47].mxu0  ;;  %v1456_v27 = vmax.f32 %v1372_v11, 0.0 }
 0x3fa   :  { %v1367_v22 = vadd.f32 %v1366_v4, %v3174_v34  ;;  %v1454_v14 = vmax.f32 %v1364_v33, 0.0 }
 0x3fb   :  { %v1457_v17 = vmax.f32 %v1375_v41, 0.0 }
 0x3fc   :  { %v1455_v10 = vmax.f32 %v1367_v22, 0.0 }
 0x3fd   :  { %v1481_v5 = vpack.c.bf16 %v1457_v17, %v1456_v27  ;;  %v1508_v17 = vsub.s32 5, %v2684_v53 }
 0x3fe   :  { %v1480_v63 = vpack.c.bf16 %v1455_v10, %v1454_v14 }
 0x3ff   :  { %v3210_v14 = vrot.slane %v3135_v44, %v1508_v17 }
 0x400   :  { %2103 = vmatprep.mubr.bf16.mxu1 %v1480_v63 }
 0x401   :  { %2104 = vmatmul.mubr.bf16.gmra.mrb[40].mxu1 %v1481_v5 }
 0x407   :  { %v2061_v46 = vpop.f32.mrb[48].mxu0 }
 0x408   :  { %v1388_v59 = vadd.f32 %v2061_v46, %v3174_v34  ;;  %v1379_v40 = vpop.f32.mrb[49].mxu0 }
 0x409   :  { %v1380_v42 = vadd.f32 %v1379_v40, %v3174_v34  ;;  %v2062_v15 = vpop.f32.mrb[50].mxu0 }
 0x40a   :  { %v1391_v16 = vadd.f32 %v2062_v15, %v3174_v34  ;;  %v1382_v37 = vpop.f32.mrb[51].mxu0  ;;  %v1460_v6 = vmax.f32 %v1388_v59, 0.0 }
 0x40b   :  { %v1383_v29 = vadd.f32 %v1382_v37, %v3174_v34  ;;  %v1458_v21 = vmax.f32 %v1380_v42, 0.0 }
 0x40c   :  { %v1461_v35 = vmax.f32 %v1391_v16, 0.0 }
 0x40d   :  { %v1459_v52 = vmax.f32 %v1383_v29, 0.0 }
 0x40e   :  { %v1483_v49 = vpack.c.bf16 %v1461_v35, %v1460_v6 }
 0x40f   :  { %v1482_v23 = vpack.c.bf16 %v1459_v52, %v1458_v21 }
 0x411   :  { %2107 = vmatprep.mubr.bf16.mxu1 %v1482_v23 }
 0x412   :  { %2108 = vmatmul.mubr.bf16.gmra.mrb[44].mxu1 %v1483_v49 }
 0x416   :  { %v2065_v13 = vpop.f32.mrb[52].mxu0 }
 0x417   :  { %v1404_v1 = vadd.f32 %v2065_v13, %v3174_v34  ;;  %v1395_v60 = vpop.f32.mrb[53].mxu0 }
 0x418   :  { %v1396_v45 = vadd.f32 %v1395_v60, %v3174_v34  ;;  %v2066_v43 = vpop.f32.mrb[54].mxu0 }
 0x419   :  { %v1407_v20 = vadd.f32 %v2066_v43, %v3174_v34  ;;  %v1398_v31 = vpop.f32.mrb[55].mxu0  ;;  %v1464_v30 = vmax.f32 %v1404_v1, 0.0 }
 0x41a   :  { %v1399_v32 = vadd.f32 %v1398_v31, %v3174_v34  ;;  %v1462_v57 = vmax.f32 %v1396_v45, 0.0 }
 0x41b   :  { %v1465_v18 = vmax.f32 %v1407_v20, 0.0 }
 0x41c   :  { %v1463_v61 = vmax.f32 %v1399_v32, 0.0 }
 0x41d   :  { %v1485_v2 = vpack.c.bf16 %v1465_v18, %v1464_v30 }
 0x41e   :  { %v1484_v25 = vpack.c.bf16 %v1463_v61, %v1462_v57 }
 0x420   :  { %2111 = vmatprep.mubr.bf16.mxu1 %v1484_v25 }
 0x421   :  { %2112 = vmatmul.mubr.bf16.gmra.mrb[48].mxu1 %v1485_v2 }
 0x426   :  { %v2069_v51 = vpop.f32.mrb[56].mxu0 }
 0x427   :  { %v1420_v9 = vadd.f32 %v2069_v51, %v3174_v34  ;;  %v1411_v3 = vpop.f32.mrb[57].mxu0 }
 0x428   :  { %v1412_v26 = vadd.f32 %v1411_v3, %v3174_v34  ;;  %v2070_v54 = vpop.f32.mrb[58].mxu0 }
 0x429   :  { %v1423_v12 = vadd.f32 %v2070_v54, %v3174_v34  ;;  %v1414_v36 = vpop.f32.mrb[59].mxu0  ;;  %v1468_v0 = vmax.f32 %v1420_v9, 0.0 }
 0x42a   :  { %v1415_v8 = vadd.f32 %v1414_v36, %v3174_v34  ;;  %v1466_v58 = vmax.f32 %v1412_v26, 0.0 }
 0x42b   :  { %v1469_v39 = vmax.f32 %v1423_v12, 0.0 }
 0x42c   :  { %v1467_v56 = vmax.f32 %v1415_v8, 0.0 }
 0x42d   :  { %v1487_v7 = vpack.c.bf16 %v1469_v39, %v1468_v0 }
 0x42e   :  { %v1486_v50 = vpack.c.bf16 %v1467_v56, %v1466_v58 }
 0x430   :  { %2115 = vmatprep.mubr.bf16.mxu1 %v1486_v50 }
 0x431   :  { %2116 = vmatmul.mubr.bf16.gmra.mrb[52].mxu1 %v1487_v7 }
 0x434   :  { %v2073_v48 = vpop.f32.mrb[60].mxu0 }
 0x435   :  { %v1436_v47 = vadd.f32 %v2073_v48, %v3174_v34  ;;  %v1427_v24 = vpop.f32.mrb[61].mxu0 }
 0x436   :  { %v1428_v38 = vadd.f32 %v1427_v24, %v3174_v34  ;;  %v2074_v28 = vpop.f32.mrb[62].mxu0 }
 0x437   :  { %v1439_v19 = vadd.f32 %v2074_v28, %v3174_v34  ;;  %v1430_v11 = vpop.f32.mrb[63].mxu0  ;;  %v1472_v33 = vmax.f32 %v1436_v47, 0.0 }
 0x438   :  { %v1431_v62 = vadd.f32 %v1430_v11, %v3174_v34  ;;  %v1470_v41 = vmax.f32 %v1428_v38, 0.0 }
 0x439   :  { %v1473_v55 = vmax.f32 %v1439_v19, 0.0 }
 0x43a   :  { %v1471_v4 = vmax.f32 %v1431_v62, 0.0 }
 0x43b   :  { %v1489_v22 = vpack.c.bf16 %v1473_v55, %v1472_v33 }
 0x43c   :  { %v1488_v27 = vpack.c.bf16 %v1471_v4, %v1470_v41 }
 0x43e   :  { %2119 = vmatprep.mubr.bf16.mxu1 %v1488_v27 }
 0x43f   :  { %2120 = vmatmul.mubr.bf16.gmra.mrb[56].mxu1 %v1489_v22 }
 0x4a4   :  { %v2093_v10 = vpop.f32.mrb[64].mxu0 }
 0x4a5   :  { %v1601_v5 = vadd.f32 %v2093_v10, %v3210_v14  ;;  %v1592_v63 = vpop.f32.mrb[65].mxu0 }
 0x4a6   :  { %v1593_v46 = vadd.f32 %v1592_v63, %v3210_v14  ;;  %v2094_v34 = vpop.f32.mrb[66].mxu0 }
 0x4a7   :  { %2306 = vtanh.f32 %v1601_v5  ;;  %v1604_v59 = vadd.f32 %v2094_v34, %v3210_v14  ;;  %v1595_v40 = vpop.f32.mrb[67].mxu0 }
 0x4a8   :  { %2308 = vtanh.f32 %v1593_v46  ;;  %v1596_v42 = vadd.f32 %v1595_v40, %v3210_v14 }
 0x4a9   :  { %2310 = vtanh.f32 %v1604_v59 }
 0x4aa   :  { %2312 = vtanh.f32 %v1596_v42 }
 0x4b1   :  { %v2307_v53 = vpop.eup %2306 }
 0x4b2   :  { %v2309_v15 = vpop.eup %2308  ;;  %1753 = vst [vmem:[#allocation13 + $0x10] sm:$0xff] %v2307_v53 }
 0x4b3   :  { %v2311_v44 = vpop.eup %2310  ;;  %1751 = vst [vmem:[#allocation13] sm:$0xff] %v2309_v15 }
 0x4b4   :  { %v2313_v16 = vpop.eup %2312  ;;  %1754 = vst [vmem:[#allocation13 + $0x18] sm:$0xff] %v2311_v44  ;;  %v2097_v37 = vpop.f32.mrb[32].mxu1 }
 0x4b5   :  { %1752 = vst [vmem:[#allocation13 + $0x8] sm:$0xff] %v2313_v16  ;;  %v1617_v29 = vadd.f32 %v2097_v37, %v3210_v14  ;;  %v1608_v6 = vpop.f32.mrb[33].mxu1 }
 0x4b6   :  { %v1609_v35 = vadd.f32 %v1608_v6, %v3210_v14  ;;  %v2098_v21 = vpop.f32.mrb[34].mxu1 }
 0x4b7   :  { %2314 = vtanh.f32 %v1617_v29  ;;  %v1620_v52 = vadd.f32 %v2098_v21, %v3210_v14  ;;  %v1611_v49 = vpop.f32.mrb[35].mxu1 }
 0x4b8   :  { %2316 = vtanh.f32 %v1609_v35  ;;  %v1612_v23 = vadd.f32 %v1611_v49, %v3210_v14 }
 0x4b9   :  { %2318 = vtanh.f32 %v1620_v52 }
 0x4ba   :  { %2320 = vtanh.f32 %v1612_v23 }
 0x4c1   :  { %v2315_v13 = vpop.eup %2314 }
 0x4c2   :  { %v2317_v1 = vpop.eup %2316  ;;  %1757 = vst [vmem:[#allocation13 + $0x30] sm:$0xff] %v2315_v13 }
 0x4c3   :  { %v2319_v60 = vpop.eup %2318  ;;  %1755 = vst [vmem:[#allocation13 + $0x20] sm:$0xff] %v2317_v1 }
 0x4c4   :  { %v2321_v45 = vpop.eup %2320  ;;  %1758 = vst [vmem:[#allocation13 + $0x38] sm:$0xff] %v2319_v60 }
 0x4c5   :  { %1756 = vst [vmem:[#allocation13 + $0x28] sm:$0xff] %v2321_v45  ;;  %v2101_v43 = vpop.f32.mrb[36].mxu1 }
 0x4c6   :  { %v1633_v20 = vadd.f32 %v2101_v43, %v3210_v14  ;;  %v1624_v31 = vpop.f32.mrb[37].mxu1 }
 0x4c7   :  { %v1625_v32 = vadd.f32 %v1624_v31, %v3210_v14  ;;  %v2102_v30 = vpop.f32.mrb[38].mxu1 }
 0x4c8   :  { %2322 = vtanh.f32 %v1633_v20  ;;  %v1636_v18 = vadd.f32 %v2102_v30, %v3210_v14  ;;  %v1627_v57 = vpop.f32.mrb[39].mxu1 }
 0x4c9   :  { %2324 = vtanh.f32 %v1625_v32  ;;  %v1628_v61 = vadd.f32 %v1627_v57, %v3210_v14 }
 0x4ca   :  { %2326 = vtanh.f32 %v1636_v18 }
 0x4cb   :  { %2328 = vtanh.f32 %v1628_v61 }
 0x4d2   :  { %v2323_v2 = vpop.eup %2322 }
 0x4d3   :  { %v2325_v25 = vpop.eup %2324  ;;  %1761 = vst [vmem:[#allocation13 + $0x50] sm:$0xff] %v2323_v2 }
 0x4d4   :  { %v2327_v51 = vpop.eup %2326  ;;  %1759 = vst [vmem:[#allocation13 + $0x40] sm:$0xff] %v2325_v25  ;;  %v2105_v9 = vpop.f32.mrb[40].mxu1 }
 0x4d5   :  { %v2329_v3 = vpop.eup %2328  ;;  %1762 = vst [vmem:[#allocation13 + $0x58] sm:$0xff] %v2327_v51  ;;  %v1649_v26 = vadd.f32 %v2105_v9, %v3210_v14  ;;  %v1640_v54 = vpop.f32.mrb[41].mxu1 }
 0x4d6   :  { %1760 = vst [vmem:[#allocation13 + $0x48] sm:$0xff] %v2329_v3  ;;  %v1641_v12 = vadd.f32 %v1640_v54, %v3210_v14  ;;  %v2106_v36 = vpop.f32.mrb[42].mxu1 }
 0x4d7   :  { %2330 = vtanh.f32 %v1649_v26  ;;  %v1652_v8 = vadd.f32 %v2106_v36, %v3210_v14  ;;  %v1643_v0 = vpop.f32.mrb[43].mxu1 }
 0x4d8   :  { %2332 = vtanh.f32 %v1641_v12  ;;  %v1644_v39 = vadd.f32 %v1643_v0, %v3210_v14 }
 0x4d9   :  { %2334 = vtanh.f32 %v1652_v8 }
 0x4da   :  { %2336 = vtanh.f32 %v1644_v39 }
 0x4e1   :  { %v2331_v58 = vpop.eup %2330 }
 0x4e2   :  { %v2333_v56 = vpop.eup %2332  ;;  %1765 = vst [vmem:[#allocation13 + $0x70] sm:$0xff] %v2331_v58 }
 0x4e3   :  { %v2335_v7 = vpop.eup %2334  ;;  %1763 = vst [vmem:[#allocation13 + $0x60] sm:$0xff] %v2333_v56 }
 0x4e4   :  { %v2337_v50 = vpop.eup %2336  ;;  %1766 = vst [vmem:[#allocation13 + $0x78] sm:$0xff] %v2335_v7 }
 0x4e5   :  { %1764 = vst [vmem:[#allocation13 + $0x68] sm:$0xff] %v2337_v50  ;;  %v2109_v48 = vpop.f32.mrb[44].mxu1 }
 0x4e6   :  { %v1665_v47 = vadd.f32 %v2109_v48, %v3210_v14  ;;  %v1656_v24 = vpop.f32.mrb[45].mxu1 }
 0x4e7   :  { %v1657_v38 = vadd.f32 %v1656_v24, %v3210_v14  ;;  %v2110_v28 = vpop.f32.mrb[46].mxu1 }
 0x4e8   :  { %2338 = vtanh.f32 %v1665_v47  ;;  %v1668_v19 = vadd.f32 %v2110_v28, %v3210_v14  ;;  %v1659_v11 = vpop.f32.mrb[47].mxu1 }
 0x4e9   :  { %2340 = vtanh.f32 %v1657_v38  ;;  %v1660_v62 = vadd.f32 %v1659_v11, %v3210_v14 }
 0x4ea   :  { %2342 = vtanh.f32 %v1668_v19 }
 0x4eb   :  { %2344 = vtanh.f32 %v1660_v62 }
 0x4f2   :  { %v2339_v33 = vpop.eup %2338 }
 0x4f3   :  { %v2341_v55 = vpop.eup %2340  ;;  %1769 = vst [vmem:[#allocation13 + $0x90] sm:$0xff] %v2339_v33 }
 0x4f4   :  { %v2343_v41 = vpop.eup %2342  ;;  %1767 = vst [vmem:[#allocation13 + $0x80] sm:$0xff] %v2341_v55  ;;  %v2113_v4 = vpop.f32.mrb[48].mxu1 }
 0x4f5   :  { %v2345_v22 = vpop.eup %2344  ;;  %1770 = vst [vmem:[#allocation13 + $0x98] sm:$0xff] %v2343_v41  ;;  %v1681_v27 = vadd.f32 %v2113_v4, %v3210_v14  ;;  %v1672_v17 = vpop.f32.mrb[49].mxu1 }
 0x4f6   :  { %1768 = vst [vmem:[#allocation13 + $0x88] sm:$0xff] %v2345_v22  ;;  %v1673_v10 = vadd.f32 %v1672_v17, %v3210_v14  ;;  %v2114_v5 = vpop.f32.mrb[50].mxu1 }
 0x4f7   :  { %2346 = vtanh.f32 %v1681_v27  ;;  %v1684_v63 = vadd.f32 %v2114_v5, %v3210_v14  ;;  %v1675_v46 = vpop.f32.mrb[51].mxu1 }
 0x4f8   :  { %2348 = vtanh.f32 %v1673_v10  ;;  %v1676_v34 = vadd.f32 %v1675_v46, %v3210_v14 }
 0x4f9   :  { %2350 = vtanh.f32 %v1684_v63 }
 0x4fa   :  { %2352 = vtanh.f32 %v1676_v34 }
 0x501   :  { %v2347_v59 = vpop.eup %2346 }
 0x502   :  { %v2349_v40 = vpop.eup %2348  ;;  %1773 = vst [vmem:[#allocation13 + $0xb0] sm:$0xff] %v2347_v59 }
 0x503   :  { %v2351_v42 = vpop.eup %2350  ;;  %1771 = vst [vmem:[#allocation13 + $0xa0] sm:$0xff] %v2349_v40 }
 0x504   :  { %v2353_v53 = vpop.eup %2352  ;;  %1774 = vst [vmem:[#allocation13 + $0xb8] sm:$0xff] %v2351_v42  ;;  %v2117_v15 = vpop.f32.mrb[52].mxu1 }
 0x505   :  { %1772 = vst [vmem:[#allocation13 + $0xa8] sm:$0xff] %v2353_v53  ;;  %v1697_v44 = vadd.f32 %v2117_v15, %v3210_v14  ;;  %v1688_v16 = vpop.f32.mrb[53].mxu1 }
 0x506   :  { %v1689_v37 = vadd.f32 %v1688_v16, %v3210_v14  ;;  %v2118_v29 = vpop.f32.mrb[54].mxu1 }
 0x507   :  { %2354 = vtanh.f32 %v1697_v44  ;;  %v1700_v6 = vadd.f32 %v2118_v29, %v3210_v14  ;;  %v1691_v35 = vpop.f32.mrb[55].mxu1 }
 0x508   :  { %2356 = vtanh.f32 %v1689_v37  ;;  %v1692_v21 = vadd.f32 %v1691_v35, %v3210_v14 }
 0x509   :  { %2358 = vtanh.f32 %v1700_v6 }
 0x50a   :  { %2360 = vtanh.f32 %v1692_v21 }
 0x511   :  { %v2355_v52 = vpop.eup %2354 }
 0x512   :  { %v2357_v49 = vpop.eup %2356  ;;  %1777 = vst [vmem:[#allocation13 + $0xd0] sm:$0xff] %v2355_v52  ;;  %v2121_v23 = vpop.f32.mrb[56].mxu1 }
 0x513   :  { %v2359_v13 = vpop.eup %2358  ;;  %1775 = vst [vmem:[#allocation13 + $0xc0] sm:$0xff] %v2357_v49  ;;  %v1713_v1 = vadd.f32 %v2121_v23, %v3210_v14  ;;  %v1704_v60 = vpop.f32.mrb[57].mxu1 }
 0x514   :  { %v2361_v45 = vpop.eup %2360  ;;  %1778 = vst [vmem:[#allocation13 + $0xd8] sm:$0xff] %v2359_v13  ;;  %v1705_v43 = vadd.f32 %v1704_v60, %v3210_v14  ;;  %v2122_v20 = vpop.f32.mrb[58].mxu1 }
 0x515   :  { %1776 = vst [vmem:[#allocation13 + $0xc8] sm:$0xff] %v2361_v45  ;;  %2362 = vtanh.f32 %v1713_v1  ;;  %v1716_v31 = vadd.f32 %v2122_v20, %v3210_v14  ;;  %v1707_v32 = vpop.f32.mrb[59].mxu1 }
 0x516   :  { %2364 = vtanh.f32 %v1705_v43  ;;  %v1708_v30 = vadd.f32 %v1707_v32, %v3210_v14 }
 0x517   :  { %2366 = vtanh.f32 %v1716_v31 }
 0x518   :  { %2368 = vtanh.f32 %v1708_v30 }
 0x51f   :  { %v2363_v18 = vpop.eup %2362 }
 0x520   :  { %v2365_v57 = vpop.eup %2364  ;;  %1781 = vst [vmem:[#allocation13 + $0xf0] sm:$0xff] %v2363_v18 }
 0x521   :  { %v2367_v61 = vpop.eup %2366  ;;  %1779 = vst [vmem:[#allocation13 + $0xe0] sm:$0xff] %v2365_v57 }
 0x522   :  { %v2369_v2 = vpop.eup %2368  ;;  %1782 = vst [vmem:[#allocation13 + $0xf8] sm:$0xff] %v2367_v61 }
 0x523   :  { %1780 = vst [vmem:[#allocation13 + $0xe8] sm:$0xff] %v2369_v2 }
 0x524   :  { %2514 = shalt.err (!%p2511_p10)
}
 0x525   :  { %s2515_s24 = scalar_lea.hbm %s3265_s6, 4096 }
 0x526   :  { %p2516_p11 = scmp.ne.s32.totalorder %s3265_s6, %s2515_s24  ;;  %p2519_p12 = scmp.lt.u32.totalorder %s2515_s24, %s3265_s6 }
 0x528   :  { %p2521_p13 = pnand %p2519_p12, %p2516_p11 }
 0x52a   :  { %2524 = shalt.err (!%p2521_p13)
}
 0x52b   :  { %1794 = dma.vmem_to_hbm [thread:$0]  %s1789_s8, 4096, %s3265_s6, [#allocation4], %s2540_s3, %s2540_s3, %s2541_s10  }
 0x52c   :  { %2533 = dma.done.wait [#allocation4], 4096  }
 0x52d   :  { %2534 = vsyncadd [#allocation4], 4294963200 }
 0x52e   :  { %1798 = vsyncpa [#allocation3], 1 }
 0x52f   :  { %1799 = vsyncpa [#allocation6], 1 }
 0x530   :  { %1800 = vsyncpa [#allocation9], 1 }
 0x531   :  { %1801 = vsyncpa [#allocation12], 1 }
 0x532   :  { %1802 = vsyncpa [#allocation4], 1 }

</bundles_post_ra>
